<compile_context>
chip_gen: v7x
topology: tpu7x:2x2x1
jax: 0.10.0
libtpu: 0.0.40
codegen_flags: <defaults>
</compile_context>

<pallas_src>
import functools

import jax
import jax.numpy as jnp
from jax import lax
from jax.experimental import pallas as pl
from jax.experimental.pallas import tpu as pltpu


# ----------------------------- Pallas kernel -------------------------------
def sab_kernel(x_ref, w_ref, b_ref, m_ref, out_ref, *, C, C8P, W):
    f32 = jnp.float32
    bf16 = jnp.bfloat16
    N = x_ref.shape[2]

    x = x_ref[0]                       # (C, N) f32
    m = m_ref[...]                     # (8, N) boundary masks (rows 0..3 used)

    # Spatial +-1 column / +-1 row shifts built in-kernel from the single
    # (C, N) block: lane rotation (XLU slot) + boundary zero-mask (VPU slot).
    xwm = pltpu.roll(x, 1 % N, 1) * m[0:1, :]        # x[h, w-1]
    xwp = pltpu.roll(x, (-1) % N, 1) * m[1:2, :]     # x[h, w+1]
    xhm = pltpu.roll(x, W % N, 1) * m[2:3, :]        # x[h-1, w]
    xhp = pltpu.roll(x, (-W) % N, 1) * m[3:4, :]     # x[h+1, w]

    x5 = jnp.concatenate([x, xwm, xwp, xhm, xhp], axis=0)        # (5C, N)

    # One fused projection matmul (f32 for q/k/v fidelity; it is tiny compared
    # with the two (N,N) attention matmuls). Row layout of w/b (folded by the
    # wrapper):
    #   [ q (C8P rows, BN+bias folded) | k (C8P) | gamma*value (C) | ones | pad ]
    proj = lax.dot_general(w_ref[...], x5, (((1,), (0,)), ((), ())),
                           preferred_element_type=f32) + b_ref[...]
    qk = jnp.maximum(proj[:2 * C8P, :], 0.0)                     # BN+ReLU (folded)
    q = qk[:C8P, :].astype(bf16)                                 # (C8P, N)
    k = qk[C8P:, :].astype(bf16)                                 # (C8P, N)
    v_ext = proj[2 * C8P:2 * C8P + C + 1, :].astype(bf16)        # gamma*V ; ones

    # affinity scores: s[i, j] = q[:, i] . k[:, j]   (bf16 MXU, f32 acc)
    s = lax.dot_general(q, k, (((0,), (0,)), ((), ())),
                        preferred_element_type=f32)               # (N, N)
    e = jnp.exp(s - jnp.max(s, axis=-1, keepdims=True)).astype(bf16)

    # [gamma*V ; 1] @ E^T gives the unnormalized weights AND the softmax
    # denominator (last row) in one MXU pass; normalize with an approx recip
    # (EUP slot) and a (C,N) multiply instead of an (N,N) divide.
    w_ext = lax.dot_general(v_ext, e, (((1,), (1,)), ((), ())),
                            preferred_element_type=f32)           # (C+1, N)
    inv = pl.reciprocal(w_ext[C:C + 1, :], approx=True)           # (1, N)
    out_ref[0] = (w_ext[:C, :] * inv + x).astype(out_ref.dtype)


# ------------------------------ JAX wrapper ---------------------------------
def spatial_attention_block(x, p):
    B, C, H, W = x.shape
    N = H * W
    C8 = C // 8
    C8P = ((C8 + 7) // 8) * 8          # pad q/k channels to the f32 sublane count
    eps = 1e-5

    # Fold conv bias + eval-mode BatchNorm into per-row weight scale / shift,
    # and fold gamma into the value weights (gamma*(V@A^T) == (gamma*V)@A^T).
    # TODO(synk): BatchNorm is folded in inference mode (running stats);
    #             training-mode batch statistics are not reproduced.
    sq = p['bn_q_w'] / jnp.sqrt(p['bn_q_v'] + eps)
    tq = (p['bq'] - p['bn_q_m']) * sq + p['bn_q_b']
    sk = p['bn_k_w'] / jnp.sqrt(p['bn_k_v'] + eps)
    tk = (p['bk'] - p['bn_k_m']) * sk + p['bn_k_b']
    gamma = p['gamma'][0]

    wq = p['wq'].astype(jnp.float32) * sq[:, None, None, None]   # (C8, C, 1, 3)
    wk = p['wk'].astype(jnp.float32) * sk[:, None, None, None]   # (C8, C, 3, 1)
    wv = p['wv'][:, :, 0, 0].astype(jnp.float32) * gamma         # (C, C)
    bv = p['bv'].astype(jnp.float32) * gamma                     # (C,)

    # Fused projection weights. Column blocks (width C each) multiply the
    # in-kernel slab [x | x(w-1) | x(w+1) | x(h-1) | x(h+1)].
    R = ((2 * C8P + C + 1 + 7) // 8) * 8
    w_fused = jnp.zeros((R, 5 * C), jnp.float32)
    w_fused = w_fused.at[:C8, 0 * C:1 * C].set(wq[:, :, 0, 1])            # q center
    w_fused = w_fused.at[:C8, 1 * C:2 * C].set(wq[:, :, 0, 0])            # q @ w-1
    w_fused = w_fused.at[:C8, 2 * C:3 * C].set(wq[:, :, 0, 2])            # q @ w+1
    w_fused = w_fused.at[C8P:C8P + C8, 0 * C:1 * C].set(wk[:, :, 1, 0])   # k center
    w_fused = w_fused.at[C8P:C8P + C8, 3 * C:4 * C].set(wk[:, :, 0, 0])   # k @ h-1
    w_fused = w_fused.at[C8P:C8P + C8, 4 * C:5 * C].set(wk[:, :, 2, 0])   # k @ h+1
    w_fused = w_fused.at[2 * C8P:2 * C8P + C, 0 * C:1 * C].set(wv)        # gamma*V

    b_fused = jnp.zeros((R, 1), jnp.float32)
    b_fused = b_fused.at[:C8, 0].set(tq)
    b_fused = b_fused.at[C8P:C8P + C8, 0].set(tk)
    b_fused = b_fused.at[2 * C8P:2 * C8P + C, 0].set(bv)
    b_fused = b_fused.at[2 * C8P + C, 0].set(1.0)   # ones row -> softmax denominator

    # Boundary masks for the in-kernel rolls, packed into one (8, N) tile.
    n_idx = jnp.arange(N)
    w_idx = n_idx % W
    masks = jnp.zeros((8, N), jnp.float32)
    masks = masks.at[0].set((w_idx != 0).astype(jnp.float32))      # w-1 valid
    masks = masks.at[1].set((w_idx != W - 1).astype(jnp.float32))  # w+1 valid
    masks = masks.at[2].set((n_idx >= W).astype(jnp.float32))      # h-1 valid
    masks = masks.at[3].set((n_idx < N - W).astype(jnp.float32))   # h+1 valid

    kernel = functools.partial(sab_kernel, C=C, C8P=C8P, W=W)
    batch_spec = pl.BlockSpec((1, C, N), lambda b: (b, 0, 0))

    # TODO(synk): for large H*W the (N,N) score block should be tiled
    #             flash-style over the key axis (only quadratic VMEM consumer).
    out_flat = pl.pallas_call(
        kernel,
        out_shape=jax.ShapeDtypeStruct((B, C, N), x.dtype),
        grid_spec=pltpu.PrefetchScalarGridSpec(
            num_scalar_prefetch=0,
            grid=(B,),
            in_specs=[batch_spec,
                      pl.BlockSpec((R, 5 * C), lambda b: (0, 0)),
                      pl.BlockSpec((R, 1), lambda b: (0, 0)),
                      pl.BlockSpec((8, N), lambda b: (0, 0))],
            out_specs=batch_spec,
        ),
        compiler_params=pltpu.CompilerParams(
            dimension_semantics=("parallel",)),
    )(x.reshape(B, C, N), w_fused, b_fused, masks)

    return out_flat.reshape(B, C, H, W)


# --------------------------- pure-JAX reference -----------------------------
def reference_forward(x, p):
    eps = 1e-5
    dn = ('NCHW', 'OIHW', 'NCHW')

    def bn(y, w, b, m, v):
        return ((y - m[None, :, None, None])
                / jnp.sqrt(v[None, :, None, None] + eps)
                * w[None, :, None, None] + b[None, :, None, None])

    q = lax.conv_general_dilated(x, p['wq'], (1, 1), [(0, 0), (1, 1)],
                                 dimension_numbers=dn) + p['bq'][None, :, None, None]
    q = jax.nn.relu(bn(q, p['bn_q_w'], p['bn_q_b'], p['bn_q_m'], p['bn_q_v']))
    k = lax.conv_general_dilated(x, p['wk'], (1, 1), [(1, 1), (0, 0)],
                                 dimension_numbers=dn) + p['bk'][None, :, None, None]
    k = jax.nn.relu(bn(k, p['bn_k_w'], p['bn_k_b'], p['bn_k_m'], p['bn_k_v']))
    v = lax.conv_general_dilated(x, p['wv'], (1, 1), [(0, 0), (0, 0)],
                                 dimension_numbers=dn) + p['bv'][None, :, None, None]

    B, C, H, W = x.shape
    N = H * W
    pq = q.reshape(B, -1, N).transpose(0, 2, 1)
    pk = k.reshape(B, -1, N)
    aff = jax.nn.softmax(jnp.matmul(pq, pk), axis=-1)
    pv = v.reshape(B, -1, N)
    w_ = jnp.matmul(pv, aff.transpose(0, 2, 1)).reshape(B, C, H, W)
    return p['gamma'] * w_ + x


# --------------------------------- main --------------------------------------
if __name__ == "__main__":
    B, C, H, W = 2, 32, 16, 16
    C8 = C // 8

    key = jax.random.PRNGKey(0)
    ks = jax.random.split(key, 12)
    s = 0.1
    params = {
        'wq': jax.random.normal(ks[0], (C8, C, 1, 3), jnp.float32) * s,
        'bq': jax.random.normal(ks[1], (C8,), jnp.float32) * s,
        'wk': jax.random.normal(ks[2], (C8, C, 3, 1), jnp.float32) * s,
        'bk': jax.random.normal(ks[3], (C8,), jnp.float32) * s,
        'wv': jax.random.normal(ks[4], (C, C, 1, 1), jnp.float32) * s,
        'bv': jax.random.normal(ks[5], (C,), jnp.float32) * s,
        'bn_q_w': 1.0 + 0.1 * jax.random.normal(ks[6], (C8,), jnp.float32),
        'bn_q_b': 0.1 * jax.random.normal(ks[7], (C8,), jnp.float32),
        'bn_q_m': jnp.zeros((C8,), jnp.float32),
        'bn_q_v': jnp.ones((C8,), jnp.float32),
        'bn_k_w': 1.0 + 0.1 * jax.random.normal(ks[8], (C8,), jnp.float32),
        'bn_k_b': 0.1 * jax.random.normal(ks[9], (C8,), jnp.float32),
        'bn_k_m': jnp.zeros((C8,), jnp.float32),
        'bn_k_v': jnp.ones((C8,), jnp.float32),
        # nn.Parameter(torch.zeros(1)) in the reference; set nonzero here so
        # the attention path is actually exercised (synthetic weights).
        'gamma': jnp.full((1,), 0.75, jnp.float32),
    }

    x = jax.random.normal(ks[10], (B, C, H, W), jnp.float32)

    out = spatial_attention_block(x, params)
    out = jax.block_until_ready(out)

    ref = jax.block_until_ready(reference_forward(x, params))
    assert out.shape == (B, C, H, W)
    # Tolerance loosened vs. a pure-f32 version: the two attention matmuls use
    # bf16 MXU operands and the softmax denominator uses an approx reciprocal.
    assert jnp.allclose(out, ref, rtol=5e-2, atol=5e-2), (
        float(jnp.max(jnp.abs(out - ref))))

    print("KERNEL_OK")
</pallas_src>

<mosaic_0001>
module attributes {stable_mosaic.version = 11 : i64} {
  func.func @sab_kernel(%arg0: i32, %arg1: memref<1x32x256xf32, #tpu.memory_space<vmem>>, %arg2: memref<56x160xf32, #tpu.memory_space<vmem>>, %arg3: memref<56x1xf32, #tpu.memory_space<vmem>>, %arg4: memref<8x256xf32, #tpu.memory_space<vmem>>, %arg5: memref<1x32x256xf32, #tpu.memory_space<vmem>>) attributes {dimension_semantics = [#tpu.dimension_semantics<parallel>], iteration_bounds = array<i64: 2>, scalar_prefetch = 0 : i64, scratch_operands = 0 : i64, tpu.core_type = #tpu.core_type<tc>, window_params = [{transform_indices = @transform_0, window_bounds = array<i64: 1, 32, 256>}, {pipeline_mode = #tpu.pipeline_mode<synchronous>, transform_indices = @transform_1, window_bounds = array<i64: 56, 160>}, {pipeline_mode = #tpu.pipeline_mode<synchronous>, transform_indices = @transform_2, window_bounds = array<i64: 56, 1>}, {pipeline_mode = #tpu.pipeline_mode<synchronous>, transform_indices = @transform_3, window_bounds = array<i64: 8, 256>}, {transform_indices = @transform_4, window_bounds = array<i64: 1, 32, 256>}]} {
    %c0 = arith.constant 0 : index
    %c0_0 = arith.constant 0 : index
    %c0_1 = arith.constant 0 : index
    %0 = vector.load %arg1[%c0, %c0_0, %c0_1] : memref<1x32x256xf32, #tpu.memory_space<vmem>>, vector<1x32x256xf32>
    %1 = vector.shape_cast %0 : vector<1x32x256xf32> to vector<32x256xf32>
    %c0_2 = arith.constant 0 : index
    %c0_3 = arith.constant 0 : index
    %2 = vector.load %arg4[%c0_2, %c0_3] : memref<8x256xf32, #tpu.memory_space<vmem>>, vector<8x256xf32>
    %c1_i32 = arith.constant 1 : i32
    %3 = tpu.dynamic_rotate %1 by %c1_i32 dim 1 : vector<32x256xf32>, i32 -> vector<32x256xf32>
    %4 = vector.extract_strided_slice %2 {offsets = [0, 0], sizes = [1, 256], strides = [1, 1]} : vector<8x256xf32> to vector<1x256xf32>
    %5 = vector.broadcast %4 : vector<1x256xf32> to vector<32x256xf32>
    %6 = arith.mulf %3, %5 : vector<32x256xf32>
    %c255_i32 = arith.constant 255 : i32
    %7 = tpu.dynamic_rotate %1 by %c255_i32 dim 1 : vector<32x256xf32>, i32 -> vector<32x256xf32>
    %8 = vector.extract_strided_slice %2 {offsets = [1, 0], sizes = [1, 256], strides = [1, 1]} : vector<8x256xf32> to vector<1x256xf32>
    %9 = vector.broadcast %8 : vector<1x256xf32> to vector<32x256xf32>
    %10 = arith.mulf %7, %9 : vector<32x256xf32>
    %c16_i32 = arith.constant 16 : i32
    %11 = tpu.dynamic_rotate %1 by %c16_i32 dim 1 : vector<32x256xf32>, i32 -> vector<32x256xf32>
    %12 = vector.extract_strided_slice %2 {offsets = [2, 0], sizes = [1, 256], strides = [1, 1]} : vector<8x256xf32> to vector<1x256xf32>
    %13 = vector.broadcast %12 : vector<1x256xf32> to vector<32x256xf32>
    %14 = arith.mulf %11, %13 : vector<32x256xf32>
    %c240_i32 = arith.constant 240 : i32
    %15 = tpu.dynamic_rotate %1 by %c240_i32 dim 1 : vector<32x256xf32>, i32 -> vector<32x256xf32>
    %16 = vector.extract_strided_slice %2 {offsets = [3, 0], sizes = [1, 256], strides = [1, 1]} : vector<8x256xf32> to vector<1x256xf32>
    %17 = vector.broadcast %16 : vector<1x256xf32> to vector<32x256xf32>
    %18 = arith.mulf %15, %17 : vector<32x256xf32>
    %19 = tpu.concatenate %1, %6, %10, %14, %18 in 0 : vector<32x256xf32>, vector<32x256xf32>, vector<32x256xf32>, vector<32x256xf32>, vector<32x256xf32> -> vector<160x256xf32>
    %c0_4 = arith.constant 0 : index
    %c0_5 = arith.constant 0 : index
    %20 = vector.load %arg2[%c0_4, %c0_5] : memref<56x160xf32, #tpu.memory_space<vmem>>, vector<56x160xf32>
    %cst = arith.constant dense<0.000000e+00> : vector<56x256xf32>
    %21 = tpu.matmul %20, %19, %cst {dimension_numbers = #tpu.dot_dimension_numbers<[1], [0], [0], [1], [0, 0, 1, 1], [], []>} : vector<56x160xf32>, vector<160x256xf32>, vector<56x256xf32> -> vector<56x256xf32>
    %c0_6 = arith.constant 0 : index
    %c0_7 = arith.constant 0 : index
    %22 = vector.load %arg3[%c0_6, %c0_7] : memref<56x1xf32, #tpu.memory_space<vmem>>, vector<56x1xf32>
    %23 = vector.broadcast %22 : vector<56x1xf32> to vector<56x256xf32>
    %24 = arith.addf %21, %23 : vector<56x256xf32>
    %25 = vector.extract_strided_slice %24 {offsets = [0, 0], sizes = [16, 256], strides = [1, 1]} : vector<56x256xf32> to vector<16x256xf32>
    %cst_8 = arith.constant 0.000000e+00 : f32
    %26 = vector.broadcast %cst_8 : f32 to vector<16x256xf32>
    %27 = arith.maximumf %25, %26 : vector<16x256xf32>
    %28 = vector.extract_strided_slice %27 {offsets = [0, 0], sizes = [8, 256], strides = [1, 1]} : vector<16x256xf32> to vector<8x256xf32>
    %29 = arith.truncf %28 : vector<8x256xf32> to vector<8x256xbf16>
    %30 = vector.extract_strided_slice %27 {offsets = [8, 0], sizes = [8, 256], strides = [1, 1]} : vector<16x256xf32> to vector<8x256xf32>
    %31 = arith.truncf %30 : vector<8x256xf32> to vector<8x256xbf16>
    %32 = vector.extract_strided_slice %24 {offsets = [16, 0], sizes = [33, 256], strides = [1, 1]} : vector<56x256xf32> to vector<33x256xf32>
    %33 = arith.truncf %32 : vector<33x256xf32> to vector<33x256xbf16>
    %cst_9 = arith.constant dense<0.000000e+00> : vector<256x256xf32>
    %34 = tpu.matmul %29, %31, %cst_9 {dimension_numbers = #tpu.dot_dimension_numbers<[0], [0], [1], [1], [0, 1, 1, 1], [], []>} : vector<8x256xbf16>, vector<8x256xbf16>, vector<256x256xf32> -> vector<256x256xf32>
    %cst_10 = arith.constant dense<0xFF800000> : vector<256xf32>
    %35 = vector.multi_reduction <maximumf>, %34, %cst_10 [1] : vector<256x256xf32> to vector<256xf32>
    %36 = vector.shape_cast %35 : vector<256xf32> to vector<256x1xf32>
    %37 = vector.broadcast %36 : vector<256x1xf32> to vector<256x256xf32>
    %38 = arith.subf %34, %37 : vector<256x256xf32>
    %39 = math.exp %38 : vector<256x256xf32>
    %40 = arith.truncf %39 : vector<256x256xf32> to vector<256x256xbf16>
    %cst_11 = arith.constant dense<0.000000e+00> : vector<33x256xf32>
    %41 = tpu.matmul %33, %40, %cst_11 {dimension_numbers = #tpu.dot_dimension_numbers<[1], [1], [0], [0], [0, 0, 1, 0], [], []>} : vector<33x256xbf16>, vector<256x256xbf16>, vector<33x256xf32> -> vector<33x256xf32>
    %42 = vector.extract_strided_slice %41 {offsets = [32, 0], sizes = [1, 256], strides = [1, 1]} : vector<33x256xf32> to vector<1x256xf32>
    %43 = tpu.reciprocal %42 {approx = true} : vector<1x256xf32> -> vector<1x256xf32>
    %44 = vector.extract_strided_slice %41 {offsets = [0, 0], sizes = [32, 256], strides = [1, 1]} : vector<33x256xf32> to vector<32x256xf32>
    %45 = vector.broadcast %43 : vector<1x256xf32> to vector<32x256xf32>
    %46 = arith.mulf %44, %45 : vector<32x256xf32>
    %47 = arith.addf %46, %1 : vector<32x256xf32>
    %c0_12 = arith.constant 0 : index
    %c0_13 = arith.constant 0 : index
    %c0_14 = arith.constant 0 : index
    %48 = vector.load %arg5[%c0_12, %c0_13, %c0_14] : memref<1x32x256xf32, #tpu.memory_space<vmem>>, vector<1x32x256xf32>
    %49 = vector.shape_cast %48 : vector<1x32x256xf32> to vector<32x256xf32>
    %50 = vector.shape_cast %47 : vector<32x256xf32> to vector<1x32x256xf32>
    tpu.vector_store %arg5[%c0_12, %c0_13, %c0_14], %50 {strides = array<i32>} : memref<1x32x256xf32, #tpu.memory_space<vmem>>, vector<1x32x256xf32>,
    return
  }
  func.func @transform_0(%arg0: i32) -> (i32, i32, i32) {
    %c0_i32 = arith.constant 0 : i32
    %c0_i32_0 = arith.constant 0 : i32
    %c0_i32_1 = arith.constant 0 : i32
    return %arg0, %c0_i32, %c0_i32_0 : i32, i32, i32
  }
  func.func @transform_1(%arg0: i32) -> (i32, i32) {
    %c0_i32 = arith.constant 0 : i32
    %c0_i32_0 = arith.constant 0 : i32
    %c0_i32_1 = arith.constant 0 : i32
    return %c0_i32, %c0_i32_0 : i32, i32
  }
  func.func @transform_2(%arg0: i32) -> (i32, i32) {
    %c0_i32 = arith.constant 0 : i32
    %c0_i32_0 = arith.constant 0 : i32
    %c0_i32_1 = arith.constant 0 : i32
    return %c0_i32, %c0_i32_0 : i32, i32
  }
  func.func @transform_3(%arg0: i32) -> (i32, i32) {
    %c0_i32 = arith.constant 0 : i32
    %c0_i32_0 = arith.constant 0 : i32
    %c0_i32_1 = arith.constant 0 : i32
    return %c0_i32, %c0_i32_0 : i32, i32
  }
  func.func @transform_4(%arg0: i32) -> (i32, i32, i32) {
    %c0_i32 = arith.constant 0 : i32
    %c0_i32_0 = arith.constant 0 : i32
    %c0_i32_1 = arith.constant 0 : i32
    return %arg0, %c0_i32, %c0_i32_0 : i32, i32, i32
  }
}

</mosaic_0001>

<bundles_post_ra>
// kernel: tpu_custom_call.1
= control target key start
LH: loop header
LB: loop body
LE: loop exit
PB: predicated region body
PF: predicated region fallthrough
CT: control target
= control target key end

     0   :  { %9 = vsyncpa [#allocation3], 0  ;;  %s2555_s0 = inlined_call_operand.hbm [shape: f32[2,32,256], index: 0, kind: input, shape index: {}]   ;;  %s2556_s1 = inlined_call_operand.hbm [shape: f32[56,160], index: 1, kind: input, shape index: {}]   ;;  %s2557_s2 = inlined_call_operand.vmem [shape: f32[56,1], index: 2, kind: input, shape index: {}]   ;;  %s2558_s3 = inlined_call_operand.vmem [shape: f32[8,256], index: 3, kind: input, shape index: {}]   ;;  %s2559_s4 = inlined_call_operand.hbm [shape: f32[2,32,256], index: 4, kind: output, shape index: {}]  }
   0x1   :  { %11 = vsyncpa [#allocation3 + $0x1], 0 }
   0x2   :  { %12 = vsyncpa [#allocation6], 0 }
   0x3   :  { %13 = vsyncpa [#allocation4], 0 }
   0x4   :  { %15 = vsyncpa [#allocation4 + $0x1], 0  ;;  %s1855_s15 = smov 0   ;;  %s1857_s16 = smov 0  }
   0x5   :  { %s1859_s17 = smov 0   ;;  %s1861_s18 = smov 0  }
   0x6 LB: > { %s1876_s19 = sadd.s32 4294967295, %s1817_s18   ;;  %s1400_s20 = sadd.s32 4294967294, %s1817_s18   ;;  %s1817_s18 = sphi %s1861_s18, %s2635_s18   ;;  %s1813_s17 = sphi %s1859_s17, %s2634_s17   ;;  %s1809_s16 = sphi %s1857_s16, %s2633_s16   ;;  %s1805_s15 = sphi %s1855_s15, %s2632_s15  }
   0x7   : > { %p41_p0 = scmp.ne.s32.totalorder %s1809_s16, %s1805_s15  ;;  %p2560_p1 = scmp.eq.s32.totalorder %s1876_s19, 0 }
   0x8   : > { %p134_p3 = scmp.eq.s32.totalorder %s1400_s20, 1  ;;  %p1401_p5 = scmp.ge.s32.totalorder %s1817_s18, 1 }
   0x9   : > { %p1885_p4 = por %p2560_p1, %p41_p0  ;;  %p141_p7 = scmp.lt.s32.totalorder %s1817_s18, 3 }
   0xa   : > { %p1890_p6 = por %p134_p3, %p41_p0  ;;  %s1819_s24 = smov [#allocation5]  }
   0xb   : > { %s2578_s21 = scalar_select %p1885_p4, 1, 0 }
   0xc   : > { %s2579_s22 = scalar_select %p1890_p6, 1, 0 }
   0xd   : > { %p1895_p8 = pnand %p1401_p5, %p141_p7  ;;  %s153_s25 = sshll.u32 %s1819_s24, 4  ;;  %s1899_s25 = int_to_ptr.vmem [resolvable:$true] %s153_s25 }
   0xe   : > { %s1911_s27 = sadd.s32 1, %s1817_s18   ;;  %s28_s28 = sadd.s32 1, %s1813_s17 }
   0xf   : > { %s2580_s23 = scalar_select %p1895_p8, 1, 0 }
  0x10   : > { %p1490_p9 = pneg %p1895_p8  ;;  %s25_s29 = ssub.s32 %s1817_s18, %s1911_s27 }
  0x11   : > { %s1689_s6 = scalar_lea.hbm %s2556_s1, 1792 }
  0x12   : > { %p1906_p11 = pnand %p1490_p9, %p2560_p1  ;;  %p1690_p12 = scmp.ne.s32.totalorder %s2556_s1, %s1689_s6 }
  0x13   : > { %p1696_p5 = scmp.lt.u32.totalorder %s1689_s6, %s2556_s1 }
  0x14   : > { %p1691_p13 = pneg %p1906_p11 }
  0x16   : > { %p1692_p0 = pnand %p1691_p13, %p1690_p12 }
  0x18   : > { %p1693_p3 = pneg %p1692_p0 }
  0x1a   : > { %p1698_p7 = pnand %p1696_p5, %p1693_p3 }
  0x1c   : > { %1701 = shalt.err (!%p1698_p7)
}
  0x1d   : > { %s1702_s11 = scalar_lea.vmem %s1899_s25, 1792  ;;  %p1710_p2 = scmp.lt.s32.totalorder %s1899_s25, %s1899_s25 }
  0x1e   : > { %p1703_p9 = scmp.ne.s32.totalorder %s1899_s25, %s1702_s11  ;;  %p1711_p6 = scmp.lt.s32.totalorder %s1702_s11, %s1702_s11 }
  0x20   : > { %p1705_p10 = pnand %p1703_p9, %p1691_p13  ;;  %p1712_p4 = por %p1711_p6, %p1710_p2 }
  0x22   : > { %p1706_p1 = pneg %p1705_p10 }
  0x24   : > { %p1713_p8 = pnand %p1712_p4, %p1706_p1 }
  0x26   : > { %1716 = shalt.err (!%p1713_p8)
}
  0x27   : > { %s1820_s12 = smov 256   ;;  %s1821_s13 = smov 16  }
  0x28   : > { %1493 = dma.hbm_to_vmem [thread:$0]  (!%p1906_p11), %s2556_s1, 1792, %s1899_s25, [#allocation6], %s1820_s12, %s1820_s12, %s1821_s13  }
  0x29   : > { %p26_p1 = scmp.eq.s32.totalorder %s25_s29, 0  ;;  %p35_p2 = scmp.ne.s32.totalorder %s1813_s17, %s1809_s16 }
  0x2a   : > { %p36_p4 = scmp.eq.s32.totalorder %s1817_s18, 0  ;;  %p1503_p6 = scmp.lt.s32.totalorder %s1817_s18, 2 }
  0x2b   : > { %s1945_s24 = scalar_select %p26_p1, %s1813_s17, %s28_s28  }
  0x2c   : > { %p37_p8 = por %p36_p4, %p35_p2  ;;  %p2582_p10 = scmp.eq.s32.totalorder %s1876_s19, 1 }
  0x2d   : > { %s173_s26 = sand.u32 1, %s1813_s17   ;;  %s1440_s5 = sshll.u32 %s1817_s18, 10 }
  0x2e   : > { %p1949_p12 = por %p2582_p10, %p35_p2  ;;  %s1404_s6 = sshll.u32 %s173_s26, 6 }
  0x2f   : > { %s1958_s9 = scalar_lea.hbm %s2555_s0, %s1440_s5  ;;  %s177_s25 = scalar_lea.vmem [#allocation2], %s1404_s6 }
  0x30   : > { %s184_s28 = sshll.u32 %s177_s25, 4  ;;  %p1960_p11 = pnand %p1503_p6, %p37_p8  ;;  %s1964_s28 = int_to_ptr.vmem [resolvable:$true] %s184_s28 }
  0x31   : > { %s1966_s10 = scalar_lea.sflag [#allocation3], %s173_s26  ;;  %s1717_s11 = scalar_lea.hbm %s1958_s9, 1024 }
  0x32   : > { %p1718_p13 = scmp.ne.s32.totalorder %s1958_s9, %s1717_s11  ;;  %p1719_p0 = pneg %p1960_p11 }
  0x33   : > { %s1722_s5 = scalar_lea.hbm %s2555_s0, 2048  ;;  %p1723_p7 = scmp.lt.u32.totalorder %s1958_s9, %s2555_s0 }
  0x34   : > { %p1720_p3 = pnand %p1719_p0, %p1718_p13  ;;  %p1724_p9 = scmp.lt.u32.totalorder %s1722_s5, %s1717_s11 }
  0x35   : > { %p1726_p2 = scmp.lt.u32.totalorder %s1717_s11, %s1958_s9 }
  0x36   : > { %p1721_p5 = pneg %p1720_p3  ;;  %p1725_p1 = por %p1724_p9, %p1723_p7 }
  0x38   : > { %p1727_p4 = por %p1726_p2, %p1725_p1 }
  0x3a   : > { %p1728_p6 = pnand %p1727_p4, %p1721_p5 }
  0x3c   : > { %1731 = shalt.err (!%p1728_p6)
}
  0x3d   : > { %s1732_s26 = scalar_lea.vmem %s1964_s28, 1024  ;;  %s1822_s8 = smov [#allocation2]  }
  0x3e   : > { %p1733_p8 = scmp.ne.s32.totalorder %s1964_s28, %s1732_s26  ;;  %s1737_s25 = sshll.u32 %s1822_s8, 4  ;;  %s1738_s25 = int_to_ptr.vmem [resolvable:$false] %s1737_s25 }
  0x3f   : > { %s1739_s14 = scalar_lea.vmem %s1738_s25, 2048  ;;  %p1740_p3 = scmp.lt.s32.totalorder %s1964_s28, %s1738_s25 }
  0x40   : > { %p1735_p10 = pnand %p1733_p8, %p1719_p0  ;;  %p1741_p7 = scmp.lt.s32.totalorder %s1739_s14, %s1732_s26 }
  0x42   : > { %p1736_p13 = pneg %p1735_p10  ;;  %p1742_p9 = por %p1741_p7, %p1740_p3 }
  0x44   : > { %p1743_p1 = pnand %p1742_p9, %p1736_p13 }
  0x46   : > { %1746 = shalt.err (!%p1743_p1)
}
  0x47   : > { %1497 = dma.hbm_to_vmem [thread:$0]  (!%p1960_p11), %s1958_s9, 1024, %s1964_s28, %s1966_s10, %s1820_s12, %s1820_s12, %s1821_s13  }
  0x48   : > { %p2585_p0 = scmp.ne.s32.totalorder %s2580_s23, 0 }
  0x4a   : > { %196 = sbr.rel (%p2585_p0) target bundleno = 1407 (0x57f), region = 36 }
  0x51   : > { %s2000_s11 = sand.u32 1, %s1809_s16   ;;  %p2586_p5 = scmp.ne.s32.totalorder %s2578_s21, 0 }
  0x52   : > { %s1408_s20 = sshll.u32 %s2000_s11, 6  ;;  %s199_s5 = scalar_lea.sflag [#allocation3], %s2000_s11 }
  0x53   : > { %s2006_s29 = scalar_lea.vmem [#allocation2], %s1408_s20 }
  0x54   : > { %1792 = dma.done.wait (%p2586_p5), %s199_s5, 1024  }
  0x55   : > { %1794 = vsyncadd (%p2586_p5), %s199_s5, 4294966272  ;;  %p2587_p11 = scmp.eq.s32.totalorder %s1876_s19, 0 }
  0x57   : > { %1796 = dma.done.wait (%p2587_p11), [#allocation6], 1792   ;;  %p2588_p2 = pmov %p2587_p11 }
  0x58   : > { %v233_v0 = vld [vmem:[%s2006_s29 + $0x8] sm:$0xff]  ;;  %v232_v1 = vld [vmem:[%s2006_s29] sm:$0xff]  ;;  %v235_v2 = vld [vmem:[%s2006_s29 + $0x18] sm:$0xff]  ;;  %s1823_s23 = smov 1   ;;  %s1824_s21 = smov 127   ;;  %vm464_vm0 = vcmask 261120   ;;  %v258_v16 = vlaneseq }
  0x59   : > { %1798 = vsyncadd (%p2588_p2), [#allocation6], 4294965504  ;;  %250 = vrot.lane.b32.xlu1 %v233_v0, %s1823_s23  ;;  %242 = vrot.lane.b32.xlu0 %v232_v1, %s1823_s23  ;;  %v234_v3 = vld [vmem:[%s2006_s29 + $0x10] sm:$0xff]  ;;  %v1442_v4 = vpack.c.bf16 %v235_v2, %v233_v0  ;;  %v239_v5 = vld [vmem:[%s2006_s29 + $0x38] sm:$0xff]  ;;  %s1825_s12 = smov 16   ;;  %s1826_s13 = smov 112  }
  0x5a   : > { %v237_v6 = vld [vmem:[%s2006_s29 + $0x28] sm:$0xff]  ;;  %v1444_v7 = vpack.c.bf16 %v234_v3, %v232_v1  ;;  %v238_v8 = vld [vmem:[%s2006_s29 + $0x30] sm:$0xff]  ;;  %v236_v9 = vld [vmem:[%s2006_s29 + $0x20] sm:$0xff]  ;;  %v1827_v13 = vmov 0   ;;  %v2042_v17 = vshrl.u32 %v258_v16, 7  ;;  %v2044_v18 = vand.u32 127, %v258_v16 }
  0x5b   : > { %1443 = vmatprep.subr.bf16.mxu0 %v1442_v4  ;;  %v1446_v10 = vpack.c.bf16 %v239_v5, %v237_v6  ;;  %v1448_v11 = vpack.c.bf16 %v238_v8, %v236_v9  ;;  %v409_v12 = vld [vmem:[#allocation5 + $0x8] sm:$0xff]  ;;  %1547 = vset.pattern.permute.xlu0 %v1827_v13  ;;  %v422_v14 = vld [vmem:[%s2557_s2] sm:$0xff]  ;;  %vm688_vm5 = vcmask 1043456   ;;  %vm639_vm6 = vcmask 64512   ;;  %s1441_s26 = sshll.u32 %s1876_s19, 10  ;;  %s2486_s8 = scalar_lea.vmem [#allocation7], %s1408_s20 }
  0x5c   : > { %1445 = vmatpush1.bf16.msra.mxu0 %v1444_v7  ;;  %1411 = vmatprep.mubr.msk.f32.mxu0 %vm464_vm0, %v409_v12  ;;  %v423_v15 = vld [vmem:[%s2557_s2 + $0x8] sm:$0xff]  ;;  %v2047_v19 = vsub.s32 0, %v2042_v17  ;;  %v2052_v20 = vld [vmem:[%s2558_s3] sm:$0xff]  ;;  %vm260_vm1 = vcmp.lt.s32.totalorder %v2044_v18, 1  ;;  %v312_v42 = vsub.s32 1, %v2042_v17  ;;  %vm301_vm2 = vcmp.lt.s32.totalorder %v2044_v18, 127  ;;  %s2496_s14 = scalar_lea.hbm %s2559_s4, %s1441_s26 }
  0x5d   : > { %252 = vrot.lane.b32.xlu1 %v235_v2, %s1823_s23  ;;  %244 = vrot.lane.b32.xlu0 %v234_v3, %s1823_s23  ;;  %v2057_v21 = vld [vmem:[%s2558_s3 + $0x8] sm:$0xff]  ;;  %vm342_vm3 = vcmp.lt.s32.totalorder %v2044_v18, 16  ;;  %vm383_vm4 = vcmp.lt.s32.totalorder %v2044_v18, 112  ;;  %s1317_s25 = sshll.u32 %s2486_s8, 4  ;;  %s1304_s5 = scalar_lea.sflag [#allocation4], %s2000_s11  ;;  %s2502_s25 = int_to_ptr.vmem [resolvable:$true] %s1317_s25 }
  0x5e   : > { %1447 = vmatprep.subr.bf16.mxu0 %v1446_v10  ;;  %1548 = vset.pattern.permute.xlu1 %v1827_v13  ;;  %2589 = vst [vmem:[#allocation11_spill] sm:$0xff] %v2047_v19  ;;  %v272_v24 = vrot.slane %v2052_v20, %v2047_v19  ;;  %v276_v25 = vrot.slane %v2057_v21, %v2047_v19 }
  0x5f   : > { %727 = vmatprep.mubr.bf16.mxu1 %v1827_v13  ;;  %v313_v55 = vrot.slane %v2052_v20, %v312_v42  ;;  %v317_v56 = vrot.slane %v2057_v21, %v312_v42 }
  0x60   : > { %1449 = vmatpush1.bf16.msra.mxu0 %v1448_v11 }
  0x61   : > { %248 = vrot.lane.b32.xlu1 %v238_v8, %s1823_s23  ;;  %246 = vrot.lane.b32.xlu0 %v236_v9, %s1823_s23 }
  0x65   : > { %256 = vrot.lane.b32.xlu1 %v239_v5, %s1823_s23  ;;  %254 = vrot.lane.b32.xlu0 %v237_v6, %s1823_s23  ;;  %s1747_s23 = scalar_lea.vmem %s2502_s25, 1024 }
  0x66   : > { %p1748_p4 = scmp.ne.s32.totalorder %s2502_s25, %s1747_s23 }
  0x68   : > { %p1749_p6 = pnand %p1748_p4, %p1949_p12 }
  0x69   : > { %287 = vrot.lane.b32.xlu1 %v234_v3, %s1824_s21  ;;  %285 = vrot.lane.b32.xlu0 %v232_v1, %s1824_s21 }
  0x6a   : > { %p1750_p8 = pneg %p1749_p6 }
  0x6d   : > { %295 = vrot.lane.b32.xlu1 %v235_v2, %s1824_s21  ;;  %293 = vrot.lane.b32.xlu0 %v233_v0, %s1824_s21 }
  0x71   : > { %291 = vrot.lane.b32.xlu1 %v238_v8, %s1824_s21  ;;  %289 = vrot.lane.b32.xlu0 %v236_v9, %s1824_s21 }
  0x75   : > { %299 = vrot.lane.b32.xlu1 %v239_v5, %s1824_s21  ;;  %297 = vrot.lane.b32.xlu0 %v237_v6, %s1824_s21 }
  0x79   : > { %328 = vrot.lane.b32.xlu1 %v234_v3, %s1825_s12  ;;  %326 = vrot.lane.b32.xlu0 %v232_v1, %s1825_s12 }
  0x7d   : > { %336 = vrot.lane.b32.xlu1 %v235_v2, %s1825_s12  ;;  %334 = vrot.lane.b32.xlu0 %v233_v0, %s1825_s12 }
  0x81   : > { %332 = vrot.lane.b32.xlu1 %v238_v8, %s1825_s12  ;;  %330 = vrot.lane.b32.xlu0 %v236_v9, %s1825_s12 }
  0x85   : > { %340 = vrot.lane.b32.xlu1 %v239_v5, %s1825_s12  ;;  %338 = vrot.lane.b32.xlu0 %v237_v6, %s1825_s12 }
  0x89   : > { %369 = vrot.lane.b32.xlu1 %v234_v3, %s1826_s13  ;;  %367 = vrot.lane.b32.xlu0 %v232_v1, %s1826_s13 }
  0x8d   : > { %377 = vrot.lane.b32.xlu1 %v235_v2, %s1826_s13  ;;  %375 = vrot.lane.b32.xlu0 %v233_v0, %s1826_s13 }
  0x91   : > { %373 = vrot.lane.b32.xlu1 %v238_v8, %s1826_s13  ;;  %371 = vrot.lane.b32.xlu0 %v236_v9, %s1826_s13  ;;  %v353_v9 = vsub.s32 2, %v2042_v17 }
  0x95   : > { %381 = vrot.lane.b32.xlu1 %v239_v5, %s1826_s13  ;;  %379 = vrot.lane.b32.xlu0 %v237_v6, %s1826_s13 }
  0x99   : > { %431 = vperm.xlu0 %1547, %v422_v14   ;;  %436 = vperm.xlu1 %1548, %v423_v15  }
  0xcb   : > { %v251_v22 = vpop.permute.xlu1 %250  ;;  %v243_v23 = vpop.permute.xlu0 %242 }
  0xcc   : > { %v261_v26 = vsel %vm260_vm1, %v243_v23, %v251_v22  ;;  %v265_v27 = vsel %vm260_vm1, %v251_v22, %v243_v23 }
  0xcd   : > { %v277_v32 = vmul.f32 %v272_v24, %v265_v27  ;;  %v278_v33 = vmul.f32 %v276_v25, %v261_v26 }
  0xcf   : > { %v253_v28 = vpop.permute.xlu1 %252  ;;  %v245_v29 = vpop.permute.xlu0 %244 }
  0xd0   : > { %v262_v30 = vsel %vm260_vm1, %v245_v29, %v253_v28  ;;  %v266_v31 = vsel %vm260_vm1, %v253_v28, %v245_v29  ;;  %v354_v28 = vrot.slane %v2052_v20, %v353_v9  ;;  %v358_v29 = vrot.slane %v2057_v21, %v353_v9 }
  0xd1   : > { %v279_v34 = vmul.f32 %v272_v24, %v266_v31  ;;  %v280_v35 = vmul.f32 %v276_v25, %v262_v30 }
  0xd3   : > { %v249_v36 = vpop.permute.xlu1 %248  ;;  %v247_v37 = vpop.permute.xlu0 %246  ;;  %v1450_v38 = vpack.c.bf16 %v280_v35, %v278_v33  ;;  %v1452_v39 = vpack.c.bf16 %v279_v34, %v277_v32 }
  0xd5   : > { %1451 = vmatprep.subr.bf16.mxu0 %v1450_v38 }
  0xd6   : > { %1453 = vmatpush1.bf16.msra.mxu0 %v1452_v39 }
  0xd7   : > { %v257_v40 = vpop.permute.xlu1 %256  ;;  %v255_v41 = vpop.permute.xlu0 %254 }
  0xd8   : > { %v264_v43 = vsel %vm260_vm1, %v249_v36, %v257_v40  ;;  %v268_v44 = vsel %vm260_vm1, %v257_v40, %v249_v36  ;;  %v263_v45 = vsel %vm260_vm1, %v247_v37, %v255_v41  ;;  %v267_v46 = vsel %vm260_vm1, %v255_v41, %v247_v37 }
  0xd9   : > { %v283_v47 = vmul.f32 %v272_v24, %v268_v44  ;;  %v284_v48 = vmul.f32 %v276_v25, %v264_v43  ;;  %v281_v49 = vmul.f32 %v272_v24, %v267_v46  ;;  %v282_v50 = vmul.f32 %v276_v25, %v263_v45 }
  0xda   : > { %v394_v46 = vsub.s32 3, %v2042_v17 }
  0xdb   : > { %v288_v51 = vpop.permute.xlu1 %287  ;;  %v286_v52 = vpop.permute.xlu0 %285  ;;  %v1454_v53 = vpack.c.bf16 %v284_v48, %v282_v50  ;;  %v1456_v54 = vpack.c.bf16 %v283_v47, %v281_v49 }
  0xdd   : > { %1455 = vmatprep.subr.bf16.mxu0 %v1454_v53 }
  0xde   : > { %1457 = vmatpush1.bf16.msra.mxu0 %v1456_v54 }
  0xdf   : > { %v296_v57 = vpop.permute.xlu1 %295  ;;  %v294_v58 = vpop.permute.xlu0 %293 }
  0xe0   : > { %v303_v59 = vsel %vm301_vm2, %v288_v51, %v296_v57  ;;  %v307_v60 = vsel %vm301_vm2, %v296_v57, %v288_v51  ;;  %v302_v61 = vsel %vm301_vm2, %v286_v52, %v294_v58  ;;  %v306_v62 = vsel %vm301_vm2, %v294_v58, %v286_v52 }
  0xe1   : > { %v320_v63 = vmul.f32 %v313_v55, %v303_v59  ;;  %v321_v0 = vmul.f32 %v317_v56, %v307_v60  ;;  %v318_v1 = vmul.f32 %v313_v55, %v302_v61  ;;  %v319_v2 = vmul.f32 %v317_v56, %v306_v62 }
  0xe2   : > { %v395_v58 = vrot.slane %v2052_v20, %v394_v46  ;;  %v399_v59 = vrot.slane %v2057_v21, %v394_v46 }
  0xe3   : > { %v292_v3 = vpop.permute.xlu1 %291  ;;  %v290_v4 = vpop.permute.xlu0 %289  ;;  %v1458_v5 = vpack.c.bf16 %v321_v0, %v319_v2  ;;  %v1460_v6 = vpack.c.bf16 %v320_v63, %v318_v1 }
  0xe5   : > { %1459 = vmatprep.subr.bf16.mxu0 %v1458_v5 }
  0xe6   : > { %1461 = vmatpush1.bf16.msra.mxu0 %v1460_v6 }
  0xe7   : > { %v300_v7 = vpop.permute.xlu1 %299  ;;  %v298_v8 = vpop.permute.xlu0 %297 }
  0xe8   : > { %v305_v10 = vsel %vm301_vm2, %v292_v3, %v300_v7  ;;  %v309_v11 = vsel %vm301_vm2, %v300_v7, %v292_v3  ;;  %v304_v12 = vsel %vm301_vm2, %v290_v4, %v298_v8  ;;  %v308_v14 = vsel %vm301_vm2, %v298_v8, %v290_v4 }
  0xe9   : > { %v324_v15 = vmul.f32 %v313_v55, %v305_v10  ;;  %v325_v16 = vmul.f32 %v317_v56, %v309_v11  ;;  %v322_v22 = vmul.f32 %v313_v55, %v304_v12  ;;  %v323_v23 = vmul.f32 %v317_v56, %v308_v14 }
  0xeb   : > { %v329_v24 = vpop.permute.xlu1 %328  ;;  %v327_v25 = vpop.permute.xlu0 %326  ;;  %v1462_v26 = vpack.c.bf16 %v325_v16, %v323_v23  ;;  %v1464_v27 = vpack.c.bf16 %v324_v15, %v322_v22 }
  0xed   : > { %1463 = vmatprep.subr.bf16.mxu0 %v1462_v26  ;;  %v408_v26 = vld [vmem:[#allocation5] sm:$0xff] }
  0xee   : > { %1465 = vmatpush1.bf16.msra.mxu0 %v1464_v27  ;;  %v411_v27 = vld [vmem:[#allocation5 + $0x18] sm:$0xff] }
  0xef   : > { %v337_v30 = vpop.permute.xlu1 %336  ;;  %v335_v31 = vpop.permute.xlu0 %334 }
  0xf0   : > { %v344_v32 = vsel %vm342_vm3, %v329_v24, %v337_v30  ;;  %v348_v33 = vsel %vm342_vm3, %v337_v30, %v329_v24  ;;  %v343_v34 = vsel %vm342_vm3, %v327_v25, %v335_v31  ;;  %v347_v35 = vsel %vm342_vm3, %v335_v31, %v327_v25 }
  0xf1   : > { %v361_v36 = vmul.f32 %v354_v28, %v348_v33  ;;  %v362_v37 = vmul.f32 %v358_v29, %v344_v32  ;;  %v359_v38 = vmul.f32 %v354_v28, %v347_v35  ;;  %v360_v39 = vmul.f32 %v358_v29, %v343_v34 }
  0xf3   : > { %v333_v40 = vpop.permute.xlu1 %332  ;;  %v331_v41 = vpop.permute.xlu0 %330  ;;  %v1466_v42 = vpack.c.bf16 %v362_v37, %v360_v39  ;;  %v1468_v43 = vpack.c.bf16 %v361_v36, %v359_v38 }
  0xf5   : > { %1467 = vmatprep.subr.bf16.mxu0 %v1466_v42 }
  0xf6   : > { %1469 = vmatpush1.bf16.msra.mxu0 %v1468_v43 }
  0xf7   : > { %v341_v44 = vpop.permute.xlu1 %340  ;;  %v339_v45 = vpop.permute.xlu0 %338 }
  0xf8   : > { %v346_v47 = vsel %vm342_vm3, %v333_v40, %v341_v44  ;;  %v350_v48 = vsel %vm342_vm3, %v341_v44, %v333_v40  ;;  %v345_v49 = vsel %vm342_vm3, %v331_v41, %v339_v45  ;;  %v349_v50 = vsel %vm342_vm3, %v339_v45, %v331_v41 }
  0xf9   : > { %v365_v51 = vmul.f32 %v354_v28, %v350_v48  ;;  %v366_v52 = vmul.f32 %v358_v29, %v346_v47  ;;  %v363_v53 = vmul.f32 %v354_v28, %v349_v50  ;;  %v364_v54 = vmul.f32 %v358_v29, %v345_v49  ;;  %v410_v28 = vld [vmem:[#allocation5 + $0x10] sm:$0xff] }
  0xfb   : > { %v370_v55 = vpop.permute.xlu1 %369  ;;  %v368_v56 = vpop.permute.xlu0 %367  ;;  %v1470_v57 = vpack.c.bf16 %v366_v52, %v364_v54  ;;  %v1472_v17 = vpack.c.bf16 %v365_v51, %v363_v53 }
  0xfd   : > { %1471 = vmatprep.subr.bf16.mxu0 %v1470_v57 }
  0xfe   : > { %1473 = vmatpush1.bf16.msra.mxu0 %v1472_v17 }
  0xff   : > { %v378_v60 = vpop.permute.xlu1 %377  ;;  %v376_v61 = vpop.permute.xlu0 %375 }
 0x100   : > { %v385_v62 = vsel %vm383_vm4, %v370_v55, %v378_v60  ;;  %v389_v63 = vsel %vm383_vm4, %v378_v60, %v370_v55  ;;  %v384_v0 = vsel %vm383_vm4, %v368_v56, %v376_v61  ;;  %v388_v1 = vsel %vm383_vm4, %v376_v61, %v368_v56 }
 0x101   : > { %v402_v2 = vmul.f32 %v395_v58, %v385_v62  ;;  %v403_v3 = vmul.f32 %v399_v59, %v389_v63  ;;  %v400_v20 = vmul.f32 %v395_v58, %v384_v0  ;;  %v401_v4 = vmul.f32 %v399_v59, %v388_v1  ;;  %v413_v62 = vld [vmem:[#allocation5 + $0x28] sm:$0xff]  ;;  %v412_v63 = vld [vmem:[#allocation5 + $0x20] sm:$0xff]  ;;  %v415_v0 = vld [vmem:[#allocation5 + $0x38] sm:$0xff] }
 0x102   : > { %v414_v1 = vld [vmem:[#allocation5 + $0x30] sm:$0xff] }
 0x103   : > { %v374_v21 = vpop.permute.xlu1 %373  ;;  %v372_v5 = vpop.permute.xlu0 %371  ;;  %v1474_v6 = vpack.c.bf16 %v403_v3, %v401_v4  ;;  %v1476_v7 = vpack.c.bf16 %v402_v2, %v400_v20  ;;  %v417_v2 = vld [vmem:[#allocation5 + $0x48] sm:$0xff]  ;;  %v416_v3 = vld [vmem:[#allocation5 + $0x40] sm:$0xff]  ;;  %v419_v20 = vld [vmem:[#allocation5 + $0x58] sm:$0xff] }
 0x104   : > { %v421_v4 = vld [vmem:[#allocation5 + $0x68] sm:$0xff] }
 0x105   : > { %1475 = vmatprep.subr.bf16.mxu0 %v1474_v6 }
 0x106   : > { %1477 = vmatpush1.bf16.msra.mxu0 %v1476_v7 }
 0x107   : > { %v382_v8 = vpop.permute.xlu1 %381  ;;  %v380_v9 = vpop.permute.xlu0 %379 }
 0x108   : > { %v387_v10 = vsel %vm383_vm4, %v374_v21, %v382_v8  ;;  %v391_v11 = vsel %vm383_vm4, %v382_v8, %v374_v21  ;;  %v386_v12 = vsel %vm383_vm4, %v372_v5, %v380_v9  ;;  %v390_v14 = vsel %vm383_vm4, %v380_v9, %v372_v5  ;;  %v420_v21 = vld [vmem:[#allocation5 + $0x60] sm:$0xff] }
 0x109   : > { %v406_v15 = vmul.f32 %v395_v58, %v387_v10  ;;  %v407_v16 = vmul.f32 %v399_v59, %v391_v11  ;;  %v404_v22 = vmul.f32 %v395_v58, %v386_v12  ;;  %v405_v23 = vmul.f32 %v399_v59, %v390_v14 }
 0x10b   : > { %v1478_v24 = vpack.c.bf16 %v407_v16, %v405_v23  ;;  %v1480_v25 = vpack.c.bf16 %v406_v15, %v404_v22 }
 0x10d   : > { %1479 = vmatprep.subr.bf16.mxu0 %v1478_v24 }
 0x10e   : > { %1481 = vmatpush1.bf16.msra.mxu0 %v1480_v25 }
 0x111   : > { %551 = vmatmul.mubr.f32.vlgmr.msra.gmra.mrb[0].mxu0 %v408_v26 }
 0x112   : > { %1412 = vmatprep.mubr.msk.f32.mxu0 %vm464_vm0, %v411_v27 }
 0x115   : > { %557 = vmatmul.mubr.f32.gmra.mrb[2].mxu0 %v410_v28 }
 0x116   : > { %1413 = vmatprep.mubr.msk.f32.mxu0 %vm464_vm0, %v413_v62 }
 0x118   : > { %v432_v29 = vpop.permute.xlu0 %431  ;;  %v437_v33 = vpop.permute.xlu1 %436 }
 0x119   : > { %563 = vmatmul.mubr.f32.gmra.mrb[4].mxu0 %v412_v63 }
 0x11a   : > { %1414 = vmatprep.mubr.msk.f32.mxu0 %vm464_vm0, %v415_v0 }
 0x11d   : > { %569 = vmatmul.mubr.f32.gmra.mrb[6].mxu0 %v414_v1 }
 0x11e   : > { %1415 = vmatprep.mubr.msk.f32.mxu0 %vm464_vm0, %v417_v2 }
 0x121   : > { %575 = vmatmul.mubr.f32.gmra.mrb[8].mxu0 %v416_v3 }
 0x122   : > { %1416 = vmatprep.mubr.msk.f32.mxu0 %vm464_vm0, %v419_v20 }
 0x1e4   : > { %v552_v30 = vpop.f32.mrb[0].mxu0 }
 0x1e5   : > { %v553_v31 = vadd.f32 %v552_v30, %v432_v29  ;;  %v554_v18 = vpop.f32.mrb[1].mxu0 }
 0x1e6   : > { %v555_v32 = vadd.f32 %v554_v18, %v432_v29 }
 0x1e7   : > { %v593_v34 = vmax.f32 %v553_v31, 0.0 }
 0x1e8   : > { %v594_v35 = vmax.f32 %v555_v32, 0.0  ;;  %v558_v36 = vpop.f32.mrb[2].mxu0 }
 0x1e9   : > { %v597_v37 = vpack.c.bf16 %v593_v34, %v593_v34  ;;  %v559_v38 = vadd.f32 %v558_v36, %v437_v33  ;;  %v560_v39 = vpop.f32.mrb[3].mxu0 }
 0x1ea   : > { %v598_v40 = vpack.c.bf16 %v594_v35, %v594_v35  ;;  %v561_v41 = vadd.f32 %v560_v39, %v437_v33 }
 0x1eb   : > { %607 = vxpose.xlu1.c.b16.start.end [1/1] (short) %v597_v37, 128  ;;  %v595_v42 = vmax.f32 %v559_v38, 0.0 }
 0x1ec   : > { %623 = vxpose.xlu0.c.b16.start.end [1/1] (short) %v598_v40, 128  ;;  %v596_v43 = vmax.f32 %v561_v41, 0.0 }
 0x1ed   : > { %v599_v44 = vpack.c.bf16 %v595_v42, %v595_v42 }
 0x1ee   : > { %v600_v45 = vpack.c.bf16 %v596_v43, %v596_v43 }
 0x1ef   : > { %v690_v46 = vsel %vm688_vm5, %v599_v44, 0 }
 0x1f0   : > { %1418 = vmatprep.subr.msk.bf16.mxu1 %vm688_vm5, %v600_v45 }
 0x1f1   : > { %696 = vmatpush1.bf16.msra.mxu1 %v690_v46 }
 0x251   : > { %v615_v47 = vpop.trf.xlu1 }
 0x252   : > { %1419 = vmatmul.mubr.msk.bf16.vlgmr.msra.gmra.mrb[0].mxu1 %vm639_vm6, %v615_v47  ;;  %v631_v55 = vpop.trf.xlu0 }
 0x253   : > { %737 = vmatprep.mubr.bf16.mxu1 %v1827_v13 }
 0x255   : > { %v616_v48 = vpop.trf.xlu1 }
 0x256   : > { %v632_v56 = vpop.trf.xlu0 }
 0x259   : > { %v617_v49 = vpop.trf.xlu1 }
 0x25a   : > { %1420 = vmatmul.mubr.msk.bf16.gmra.mrb[4].mxu1 %vm639_vm6, %v616_v48  ;;  %v633_v57 = vpop.trf.xlu0 }
 0x25b   : > { %747 = vmatprep.mubr.bf16.mxu1 %v1827_v13 }
 0x25d   : > { %v618_v50 = vpop.trf.xlu1 }
 0x25e   : > { %v634_v17 = vpop.trf.xlu0 }
 0x261   : > { %v619_v51 = vpop.trf.xlu1 }
 0x262   : > { %1421 = vmatmul.mubr.msk.bf16.gmra.mrb[8].mxu1 %vm639_vm6, %v617_v49  ;;  %v635_v58 = vpop.trf.xlu0 }
 0x263   : > { %757 = vmatprep.mubr.bf16.mxu1 %v1827_v13 }
 0x265   : > { %v620_v52 = vpop.trf.xlu1 }
 0x266   : > { %v636_v59 = vpop.trf.xlu0 }
 0x269   : > { %v621_v53 = vpop.trf.xlu1 }
 0x26a   : > { %1422 = vmatmul.mubr.msk.bf16.gmra.mrb[12].mxu1 %vm639_vm6, %v618_v50  ;;  %v637_v60 = vpop.trf.xlu0 }
 0x26b   : > { %767 = vmatprep.mubr.bf16.mxu1 %v1827_v13 }
 0x26d   : > { %v622_v54 = vpop.trf.xlu1 }
 0x26e   : > { %v638_v61 = vpop.trf.xlu0 }
 0x272   : > { %1423 = vmatmul.mubr.msk.bf16.gmra.mrb[16].mxu1 %vm639_vm6, %v619_v51 }
 0x273   : > { %777 = vmatprep.mubr.bf16.mxu1 %v1827_v13 }
 0x27a   : > { %1424 = vmatmul.mubr.msk.bf16.gmra.mrb[20].mxu1 %vm639_vm6, %v620_v52 }
 0x27b   : > { %787 = vmatprep.mubr.bf16.mxu1 %v1827_v13 }
 0x282   : > { %1425 = vmatmul.mubr.msk.bf16.gmra.mrb[24].mxu1 %vm639_vm6, %v621_v53 }
 0x283   : > { %797 = vmatprep.mubr.bf16.mxu1 %v1827_v13 }
 0x28a   : > { %1426 = vmatmul.mubr.msk.bf16.gmra.mrb[28].mxu1 %vm639_vm6, %v622_v54 }
 0x28b   : > { %807 = vmatprep.mubr.bf16.mxu1 %v1827_v13 }
 0x292   : > { %1427 = vmatmul.mubr.msk.bf16.gmra.mrb[32].mxu1 %vm639_vm6, %v631_v55 }
 0x293   : > { %817 = vmatprep.mubr.bf16.mxu1 %v1827_v13 }
 0x29a   : > { %1428 = vmatmul.mubr.msk.bf16.gmra.mrb[36].mxu1 %vm639_vm6, %v632_v56 }
 0x29b   : > { %827 = vmatprep.mubr.bf16.mxu1 %v1827_v13 }
 0x2a2   : > { %1429 = vmatmul.mubr.msk.bf16.gmra.mrb[40].mxu1 %vm639_vm6, %v633_v57 }
 0x2a3   : > { %837 = vmatprep.mubr.bf16.mxu1 %v1827_v13 }
 0x2aa   : > { %1430 = vmatmul.mubr.msk.bf16.gmra.mrb[44].mxu1 %vm639_vm6, %v634_v17 }
 0x2ab   : > { %847 = vmatprep.mubr.bf16.mxu1 %v1827_v13 }
 0x2b2   : > { %1431 = vmatmul.mubr.msk.bf16.gmra.mrb[48].mxu1 %vm639_vm6, %v635_v58 }
 0x2b3   : > { %857 = vmatprep.mubr.bf16.mxu1 %v1827_v13 }
 0x2ba   : > { %1432 = vmatmul.mubr.msk.bf16.gmra.mrb[52].mxu1 %vm639_vm6, %v636_v59 }
 0x2bb   : > { %867 = vmatprep.mubr.bf16.mxu1 %v1827_v13 }
 0x2c2   : > { %1433 = vmatmul.mubr.msk.bf16.gmra.mrb[56].mxu1 %vm639_vm6, %v637_v60 }
 0x2c3   : > { %877 = vmatprep.mubr.bf16.mxu1 %v1827_v13  ;;  %v418_v13 = vld [vmem:[#allocation5 + $0x50] sm:$0xff] }
 0x2c4   : > { %581 = vmatmul.mubr.f32.gmra.mrb[10].mxu0 %v418_v13 }
 0x2c5   : > { %1417 = vmatprep.mubr.msk.f32.mxu0 %vm464_vm0, %v421_v4 }
 0x2c8   : > { %587 = vmatmul.mubr.f32.gmra.mrb[12].mxu0 %v420_v21 }
 0x2ca   : > { %1434 = vmatmul.mubr.msk.bf16.gmra.mrb[60].mxu1 %vm639_vm6, %v638_v61 }
 0x325   : > { %v2177_v5 = vpop.f32.mrb[0].mxu1 }
 0x326   : > { %v2179_v6 = vpop.f32.mrb[1].mxu1 }
 0x327   : > { %v2181_v7 = vpop.f32.mrb[2].mxu1  ;;  %v888_v8 = vmax.f32 %v2177_v5, %v2179_v6 }
 0x328   : > { %v2185_v9 = vpop.f32.mrb[3].mxu1 }
 0x329   : > { %889 = vmax.xlane.f32.xlu0 %v888_v8  ;;  %v891_v10 = vmax.f32 %v2181_v7, %v2185_v9 }
 0x32b   : > { %892 = vmax.xlane.f32.xlu1 %v891_v10 }
 0x32d   : > { %v2189_v11 = vpop.f32.mrb[4].mxu1 }
 0x32e   : > { %v2191_v12 = vpop.f32.mrb[5].mxu1 }
 0x32f   : > { %v2193_v14 = vpop.f32.mrb[6].mxu1  ;;  %v894_v15 = vmax.f32 %v2189_v11, %v2191_v12 }
 0x330   : > { %v2197_v16 = vpop.f32.mrb[7].mxu1 }
 0x331   : > { %895 = vmax.xlane.f32.xlu0 %v894_v15  ;;  %v897_v22 = vmax.f32 %v2193_v14, %v2197_v16 }
 0x333   : > { %898 = vmax.xlane.f32.xlu1 %v897_v22 }
 0x335   : > { %v2201_v23 = vpop.f32.mrb[8].mxu1 }
 0x336   : > { %v2203_v24 = vpop.f32.mrb[9].mxu1 }
 0x337   : > { %v2205_v25 = vpop.f32.mrb[10].mxu1  ;;  %v900_v26 = vmax.f32 %v2201_v23, %v2203_v24 }
 0x338   : > { %v2209_v27 = vpop.f32.mrb[11].mxu1 }
 0x339   : > { %901 = vmax.xlane.f32.xlu0 %v900_v26  ;;  %v903_v28 = vmax.f32 %v2205_v25, %v2209_v27 }
 0x33b   : > { %904 = vmax.xlane.f32.xlu1 %v903_v28 }
 0x33d   : > { %v2213_v29 = vpop.f32.mrb[12].mxu1 }
 0x33e   : > { %v2215_v30 = vpop.f32.mrb[13].mxu1 }
 0x33f   : > { %v2217_v31 = vpop.f32.mrb[14].mxu1  ;;  %v906_v18 = vmax.f32 %v2213_v29, %v2215_v30 }
 0x340   : > { %v2221_v32 = vpop.f32.mrb[15].mxu1 }
 0x341   : > { %907 = vmax.xlane.f32.xlu0 %v906_v18  ;;  %v909_v33 = vmax.f32 %v2217_v31, %v2221_v32 }
 0x343   : > { %910 = vmax.xlane.f32.xlu1 %v909_v33 }
 0x345   : > { %v2225_v34 = vpop.f32.mrb[16].mxu1 }
 0x346   : > { %v2227_v35 = vpop.f32.mrb[17].mxu1 }
 0x347   : > { %v2229_v36 = vpop.f32.mrb[18].mxu1  ;;  %v912_v37 = vmax.f32 %v2225_v34, %v2227_v35 }
 0x348   : > { %v2233_v38 = vpop.f32.mrb[19].mxu1 }
 0x349   : > { %913 = vmax.xlane.f32.xlu0 %v912_v37  ;;  %v915_v39 = vmax.f32 %v2229_v36, %v2233_v38 }
 0x34b   : > { %916 = vmax.xlane.f32.xlu1 %v915_v39 }
 0x34d   : > { %v2237_v40 = vpop.f32.mrb[20].mxu1 }
 0x34e   : > { %v2239_v41 = vpop.f32.mrb[21].mxu1 }
 0x34f   : > { %v2241_v42 = vpop.f32.mrb[22].mxu1  ;;  %v918_v43 = vmax.f32 %v2237_v40, %v2239_v41 }
 0x350   : > { %v2245_v44 = vpop.f32.mrb[23].mxu1 }
 0x351   : > { %919 = vmax.xlane.f32.xlu0 %v918_v43  ;;  %v921_v45 = vmax.f32 %v2241_v42, %v2245_v44 }
 0x353   : > { %922 = vmax.xlane.f32.xlu1 %v921_v45 }
 0x355   : > { %v2249_v46 = vpop.f32.mrb[24].mxu1 }
 0x356   : > { %v2251_v47 = vpop.f32.mrb[25].mxu1 }
 0x357   : > { %v2253_v48 = vpop.f32.mrb[26].mxu1  ;;  %v924_v49 = vmax.f32 %v2249_v46, %v2251_v47 }
 0x358   : > { %v2257_v50 = vpop.f32.mrb[27].mxu1 }
 0x359   : > { %925 = vmax.xlane.f32.xlu0 %v924_v49  ;;  %v927_v51 = vmax.f32 %v2253_v48, %v2257_v50 }
 0x35b   : > { %928 = vmax.xlane.f32.xlu1 %v927_v51 }
 0x35d   : > { %v2261_v52 = vpop.f32.mrb[28].mxu1 }
 0x35e   : > { %v2263_v53 = vpop.f32.mrb[29].mxu1 }
 0x35f   : > { %v2265_v54 = vpop.f32.mrb[30].mxu1  ;;  %v930_v55 = vmax.f32 %v2261_v52, %v2263_v53 }
 0x360   : > { %v2269_v56 = vpop.f32.mrb[31].mxu1 }
 0x361   : > { %931 = vmax.xlane.f32.xlu0 %v930_v55  ;;  %v933_v57 = vmax.f32 %v2265_v54, %v2269_v56 }
 0x363   : > { %934 = vmax.xlane.f32.xlu1 %v933_v57 }
 0x365   : > { %v2273_v17 = vpop.f32.mrb[32].mxu1 }
 0x366   : > { %v2275_v58 = vpop.f32.mrb[33].mxu1 }
 0x367   : > { %v2277_v59 = vpop.f32.mrb[34].mxu1  ;;  %v936_v60 = vmax.f32 %v2273_v17, %v2275_v58 }
 0x368   : > { %v2281_v61 = vpop.f32.mrb[35].mxu1 }
 0x369   : > { %937 = vmax.xlane.f32.xlu0 %v936_v60  ;;  %v939_v62 = vmax.f32 %v2277_v59, %v2281_v61 }
 0x36b   : > { %940 = vmax.xlane.f32.xlu1 %v939_v62 }
 0x36d   : > { %v2285_v63 = vpop.f32.mrb[36].mxu1 }
 0x36e   : > { %v2287_v0 = vpop.f32.mrb[37].mxu1 }
 0x36f   : > { %v2289_v1 = vpop.f32.mrb[38].mxu1  ;;  %v942_v2 = vmax.f32 %v2285_v63, %v2287_v0 }
 0x370   : > { %v2293_v3 = vpop.f32.mrb[39].mxu1 }
 0x371   : > { %943 = vmax.xlane.f32.xlu0 %v942_v2  ;;  %v945_v20 = vmax.f32 %v2289_v1, %v2293_v3 }
 0x373   : > { %946 = vmax.xlane.f32.xlu1 %v945_v20 }
 0x375   : > { %v2297_v13 = vpop.f32.mrb[40].mxu1 }
 0x376   : > { %v2299_v4 = vpop.f32.mrb[41].mxu1 }
 0x377   : > { %v2301_v21 = vpop.f32.mrb[42].mxu1  ;;  %v948_v8 = vmax.f32 %v2297_v13, %v2299_v4 }
 0x378   : > { %v2305_v10 = vpop.f32.mrb[43].mxu1 }
 0x379   : > { %949 = vmax.xlane.f32.xlu0 %v948_v8  ;;  %v951_v15 = vmax.f32 %v2301_v21, %v2305_v10 }
 0x37b   : > { %952 = vmax.xlane.f32.xlu1 %v951_v15 }
 0x37d   : > { %v2309_v22 = vpop.f32.mrb[44].mxu1 }
 0x37e   : > { %v2311_v26 = vpop.f32.mrb[45].mxu1 }
 0x37f   : > { %v2313_v28 = vpop.f32.mrb[46].mxu1  ;;  %v954_v18 = vmax.f32 %v2309_v22, %v2311_v26 }
 0x380   : > { %v2317_v33 = vpop.f32.mrb[47].mxu1 }
 0x381   : > { %955 = vmax.xlane.f32.xlu0 %v954_v18  ;;  %v957_v37 = vmax.f32 %v2313_v28, %v2317_v33 }
 0x383   : > { %958 = vmax.xlane.f32.xlu1 %v957_v37 }
 0x385   : > { %v2321_v39 = vpop.f32.mrb[48].mxu1 }
 0x386   : > { %v2323_v43 = vpop.f32.mrb[49].mxu1 }
 0x387   : > { %2590 = vst [vmem:[#allocation12_spill] sm:$0xff] %v2323_v43  ;;  %v2325_v45 = vpop.f32.mrb[50].mxu1  ;;  %v960_v49 = vmax.f32 %v2321_v39, %v2323_v43 }
 0x388   : > { %2591 = vst [vmem:[#allocation13_spill] sm:$0xff] %v2325_v45  ;;  %v2329_v51 = vpop.f32.mrb[51].mxu1 }
 0x389   : > { %2592 = vst [vmem:[#allocation14_spill] sm:$0xff] %v2329_v51  ;;  %961 = vmax.xlane.f32.xlu0 %v960_v49  ;;  %v963_v55 = vmax.f32 %v2325_v45, %v2329_v51 }
 0x38b   : > { %964 = vmax.xlane.f32.xlu1 %v963_v55 }
 0x38d   : > { %v2333_v57 = vpop.f32.mrb[52].mxu1 }
 0x38e   : > { %2593 = vst [vmem:[#allocation15_spill] sm:$0xff] %v2333_v57  ;;  %v2335_v60 = vpop.f32.mrb[53].mxu1 }
 0x38f   : > { %2594 = vst [vmem:[#allocation16_spill] sm:$0xff] %v2335_v60  ;;  %v2337_v62 = vpop.f32.mrb[54].mxu1  ;;  %v966_v2 = vmax.f32 %v2333_v57, %v2335_v60 }
 0x390   : > { %2595 = vst [vmem:[#allocation17_spill] sm:$0xff] %v2337_v62  ;;  %v2341_v20 = vpop.f32.mrb[55].mxu1 }
 0x391   : > { %2596 = vst [vmem:[#allocation18_spill] sm:$0xff] %v2341_v20  ;;  %967 = vmax.xlane.f32.xlu0 %v966_v2  ;;  %v969_v8 = vmax.f32 %v2337_v62, %v2341_v20 }
 0x393   : > { %970 = vmax.xlane.f32.xlu1 %v969_v8 }
 0x395   : > { %v2345_v15 = vpop.f32.mrb[56].mxu1 }
 0x396   : > { %2597 = vst [vmem:[#allocation19_spill] sm:$0xff] %v2345_v15  ;;  %v2347_v18 = vpop.f32.mrb[57].mxu1 }
 0x397   : > { %2598 = vst [vmem:[#allocation20_spill] sm:$0xff] %v2347_v18  ;;  %v2349_v37 = vpop.f32.mrb[58].mxu1  ;;  %v972_v49 = vmax.f32 %v2345_v15, %v2347_v18 }
 0x398   : > { %2599 = vst [vmem:[#allocation21_spill] sm:$0xff] %v2349_v37  ;;  %v2353_v55 = vpop.f32.mrb[59].mxu1 }
 0x399   : > { %2600 = vst [vmem:[#allocation22_spill] sm:$0xff] %v2353_v55  ;;  %973 = vmax.xlane.f32.xlu0 %v972_v49  ;;  %v975_v19 = vmax.f32 %v2349_v37, %v2353_v55  ;;  %v425_v49 = vld [vmem:[%s2557_s2 + $0x18] sm:$0xff] }
 0x39b   : > { %976 = vmax.xlane.f32.xlu1 %v975_v19  ;;  %v2372_v19 = vpop.f32.mrb[4].mxu0 }
 0x39c   : > { %2603 = vst [vmem:[#allocation25_spill] sm:$0xff] %v2372_v19  ;;  %v2374_v55 = vpop.f32.mrb[5].mxu0 }
 0x39d   : > { %v2357_v2 = vpop.f32.mrb[60].mxu1  ;;  %2604 = vst [vmem:[#allocation26_spill] sm:$0xff] %v2374_v55  ;;  %v2376_v37 = vpop.f32.mrb[6].mxu0 }
 0x39e   : > { %2601 = vst [vmem:[#allocation23_spill] sm:$0xff] %v2357_v2  ;;  %v2359_v20 = vpop.f32.mrb[61].mxu1  ;;  %2605 = vst [vmem:[#allocation27_spill] sm:$0xff] %v2376_v37 }
 0x39f   : > { %2602 = vst [vmem:[#allocation24_spill] sm:$0xff] %v2359_v20  ;;  %v978_v8 = vmax.f32 %v2357_v2, %v2359_v20  ;;  %v2363_v62 = vpop.f32.mrb[62].mxu1  ;;  %v2378_v20 = vpop.f32.mrb[7].mxu0 }
 0x3a0   : > { %v2365_v60 = vpop.f32.mrb[63].mxu1  ;;  %2606 = vst [vmem:[#allocation28_spill] sm:$0xff] %v2378_v20  ;;  %v2390_v37 = vpop.f32.mrb[8].mxu0 }
 0x3a1   : > { %979 = vmax.xlane.f32.xlu0 %v978_v8  ;;  %v424_v8 = vld [vmem:[%s2557_s2 + $0x10] sm:$0xff]  ;;  %2607 = vst [vmem:[#allocation29_spill] sm:$0xff] %v2390_v37  ;;  %v2392_v45 = vpop.f32.mrb[9].mxu0 }
 0x3a2   : > { %2608 = vst [vmem:[#allocation30_spill] sm:$0xff] %v2392_v45 }
 0x3ac   : > { %446 = vperm.xlu1 %1548, %v425_v49   ;;  %v427_v49 = vld [vmem:[%s2557_s2 + $0x28] sm:$0xff] }
 0x3b6   : > { %v890_v2 = vpop.xlane.xlu0 %889 }
 0x3b7   : > { %v984_v18 = vsub.f32 %v2177_v5, %v890_v2  ;;  %v985_v15 = vsub.f32 %v2179_v6, %v890_v2  ;;  %441 = vperm.xlu0 %1547, %v424_v8   ;;  %v2394_v6 = vpop.f32.mrb[10].mxu0 }
 0x3b8   : > { %v893_v57 = vpop.xlane.xlu1 %892  ;;  %v2396_v2 = vpop.f32.mrb[11].mxu0 }
 0x3b9   : > { %v1048_v55 = vmul.f32 1.442695, %v984_v18  ;;  %v986_v19 = vsub.f32 %v2181_v7, %v893_v57  ;;  %v987_v20 = vsub.f32 %v2185_v9, %v893_v57  ;;  %v1050_v51 = vmul.f32 1.442695, %v985_v15 }
 0x3bb   : > { %v1052_v43 = vmul.f32 1.442695, %v986_v19  ;;  %v1054_v5 = vmul.f32 1.442695, %v987_v20  ;;  %456 = vperm.xlu0 %1547, %v427_v49   ;;  %1549 = vpow2.f32 %v1048_v55 }
 0x3bd   : > { %1551 = vpow2.f32 %v1052_v43 }
 0x3be   : > { %1553 = vpow2.f32 %v1054_v5  ;;  %v896_v18 = vpop.xlane.xlu0 %895 }
 0x3bf   : > { %1555 = vpow2.f32 %v1050_v51  ;;  %v988_v7 = vsub.f32 %v2189_v11, %v896_v18  ;;  %v989_v9 = vsub.f32 %v2191_v12, %v896_v18 }
 0x3c0   : > { %v899_v57 = vpop.xlane.xlu1 %898 }
 0x3c1   : > { %v1056_v15 = vmul.f32 1.442695, %v988_v7  ;;  %v990_v8 = vsub.f32 %v2193_v14, %v899_v57  ;;  %v991_v20 = vsub.f32 %v2197_v16, %v899_v57  ;;  %v1058_v19 = vmul.f32 1.442695, %v989_v9 }
 0x3c3   : > { %v1060_v49 = vmul.f32 1.442695, %v990_v8  ;;  %v1062_v45 = vmul.f32 1.442695, %v991_v20  ;;  %1557 = vpow2.f32 %v1056_v15 }
 0x3c5   : > { %1559 = vpow2.f32 %v1060_v49  ;;  %v1550_v55 = vpop.eup %1549 }
 0x3c6   : > { %1561 = vpow2.f32 %v1062_v45  ;;  %v902_v43 = vpop.xlane.xlu0 %901 }
 0x3c7   : > { %v1552_v5 = vpop.eup %1551  ;;  %1563 = vpow2.f32 %v1058_v19  ;;  %v992_v11 = vsub.f32 %v2201_v23, %v902_v43  ;;  %v993_v12 = vsub.f32 %v2203_v24, %v902_v43 }
 0x3c8   : > { %v1554_v51 = vpop.eup %1553  ;;  %v905_v18 = vpop.xlane.xlu1 %904  ;;  %v1176_v7 = vpack.c.bf16 %v1552_v5, %v1550_v55 }
 0x3c9   : > { %v1556_v14 = vpop.eup %1555  ;;  %v1064_v37 = vmul.f32 1.442695, %v992_v11  ;;  %v994_v16 = vsub.f32 %v2205_v25, %v905_v18  ;;  %v995_v9 = vsub.f32 %v2209_v27, %v905_v18  ;;  %v1066_v15 = vmul.f32 1.442695, %v993_v12 }
 0x3ca   : > { %v1177_v57 = vpack.c.bf16 %v1554_v51, %v1556_v14  ;;  %v2609_v27 = vmax.f32 %v2363_v62, %v2365_v60 }
 0x3cb   : > { %v1068_v8 = vmul.f32 1.442695, %v994_v16  ;;  %v1070_v45 = vmul.f32 1.442695, %v995_v9  ;;  %1565 = vpow2.f32 %v1064_v37 }
 0x3cc   : > { %1208 = vmatprep.subr.bf16.mxu1 %v1177_v57 }
 0x3cd   : > { %1567 = vpow2.f32 %v1068_v8  ;;  %1209 = vmatpush1.bf16.xpose.msra.mxu1 %v1176_v7  ;;  %v1558_v23 = vpop.eup %1557 }
 0x3ce   : > { %1569 = vpow2.f32 %v1070_v45  ;;  %v908_v24 = vpop.xlane.xlu0 %907 }
 0x3cf   : > { %v1560_v20 = vpop.eup %1559  ;;  %1571 = vpow2.f32 %v1066_v15  ;;  %v996_v19 = vsub.f32 %v2213_v29, %v908_v24  ;;  %v997_v49 = vsub.f32 %v2215_v30, %v908_v24 }
 0x3d0   : > { %v1562_v25 = vpop.eup %1561  ;;  %982 = vmax.xlane.f32.xlu1 %v2609_v27  ;;  %v911_v55 = vpop.xlane.xlu1 %910  ;;  %v1178_v43 = vpack.c.bf16 %v1560_v20, %v1558_v23  ;;  %v426_v27 = vld [vmem:[%s2557_s2 + $0x20] sm:$0xff] }
 0x3d1   : > { %v1564_v37 = vpop.eup %1563  ;;  %v1072_v5 = vmul.f32 1.442695, %v996_v19  ;;  %v998_v11 = vsub.f32 %v2217_v31, %v911_v55  ;;  %v999_v12 = vsub.f32 %v2221_v32, %v911_v55  ;;  %v1074_v18 = vmul.f32 1.442695, %v997_v49 }
 0x3d2   : > { %v1179_v51 = vpack.c.bf16 %v1562_v25, %v1564_v37 }
 0x3d3   : > { %v1076_v7 = vmul.f32 1.442695, %v998_v11  ;;  %v1078_v14 = vmul.f32 1.442695, %v999_v12  ;;  %1573 = vpow2.f32 %v1072_v5 }
 0x3d4   : > { %1210 = vmatprep.subr.bf16.mxu1 %v1179_v51 }
 0x3d5   : > { %1575 = vpow2.f32 %v1076_v7  ;;  %1211 = vmatpush1.bf16.xpose.msra.mxu1 %v1178_v43  ;;  %v1566_v29 = vpop.eup %1565 }
 0x3d6   : > { %1577 = vpow2.f32 %v1078_v14  ;;  %v914_v30 = vpop.xlane.xlu0 %913  ;;  %v428_v14 = vld [vmem:[%s2557_s2 + $0x30] sm:$0xff] }
 0x3d7   : > { %v1568_v16 = vpop.eup %1567  ;;  %1579 = vpow2.f32 %v1074_v18  ;;  %v1000_v9 = vsub.f32 %v2225_v34, %v914_v30  ;;  %v1001_v57 = vsub.f32 %v2227_v35, %v914_v30 }
 0x3d8   : > { %v1570_v31 = vpop.eup %1569  ;;  %v917_v15 = vpop.xlane.xlu1 %916  ;;  %v1180_v32 = vpack.c.bf16 %v1568_v16, %v1566_v29 }
 0x3d9   : > { %v1572_v8 = vpop.eup %1571  ;;  %v1080_v45 = vmul.f32 1.442695, %v1000_v9  ;;  %v1002_v23 = vsub.f32 %v2229_v36, %v917_v15  ;;  %v1003_v24 = vsub.f32 %v2233_v38, %v917_v15  ;;  %v1082_v19 = vmul.f32 1.442695, %v1001_v57 }
 0x3da   : > { %v1181_v20 = vpack.c.bf16 %v1570_v31, %v1572_v8 }
 0x3db   : > { %v1084_v49 = vmul.f32 1.442695, %v1002_v23  ;;  %v1086_v25 = vmul.f32 1.442695, %v1003_v24  ;;  %1581 = vpow2.f32 %v1080_v45 }
 0x3dc   : > { %1212 = vmatprep.subr.bf16.mxu1 %v1181_v20 }
 0x3dd   : > { %1583 = vpow2.f32 %v1084_v49  ;;  %1213 = vmatpush1.bf16.xpose.msra.mxu1 %v1180_v32  ;;  %v1574_v34 = vpop.eup %1573 }
 0x3de   : > { %1585 = vpow2.f32 %v1086_v25  ;;  %v920_v35 = vpop.xlane.xlu0 %919 }
 0x3df   : > { %v1576_v55 = vpop.eup %1575  ;;  %1587 = vpow2.f32 %v1082_v19  ;;  %v1004_v36 = vsub.f32 %v2237_v40, %v920_v35  ;;  %v1005_v38 = vsub.f32 %v2239_v41, %v920_v35  ;;  %v2427_v41 = vpop.f32.mrb[12].mxu0 }
 0x3e0   : > { %v1578_v43 = vpop.eup %1577  ;;  %v923_v37 = vpop.xlane.xlu1 %922  ;;  %v1182_v5 = vpack.c.bf16 %v1576_v55, %v1574_v34 }
 0x3e1   : > { %v1580_v11 = vpop.eup %1579  ;;  %v1088_v12 = vmul.f32 1.442695, %v1004_v36  ;;  %v1006_v51 = vsub.f32 %v2241_v42, %v923_v37  ;;  %v1007_v18 = vsub.f32 %v2245_v44, %v923_v37  ;;  %451 = vperm.xlu1 %1548, %v426_v27   ;;  %v1090_v29 = vmul.f32 1.442695, %v1005_v38  ;;  %v2429_v16 = vpop.f32.mrb[13].mxu0 }
 0x3e2   : > { %v1183_v7 = vpack.c.bf16 %v1578_v43, %v1580_v11 }
 0x3e3   : > { %v1092_v30 = vmul.f32 1.442695, %v1006_v51  ;;  %v1094_v40 = vmul.f32 1.442695, %v1007_v18  ;;  %1589 = vpow2.f32 %v1088_v12 }
 0x3e4   : > { %1214 = vmatprep.subr.bf16.mxu1 %v1183_v7 }
 0x3e5   : > { %1591 = vpow2.f32 %v1092_v30  ;;  %1215 = vmatpush1.bf16.xpose.msra.mxu1 %v1182_v5  ;;  %461 = vperm.xlu1 %1548, %v428_v14   ;;  %v1582_v42 = vpop.eup %1581 }
 0x3e6   : > { %1593 = vpow2.f32 %v1094_v40  ;;  %v926_v44 = vpop.xlane.xlu0 %925 }
 0x3e7   : > { %v1584_v9 = vpop.eup %1583  ;;  %1595 = vpow2.f32 %v1090_v29  ;;  %v1008_v57 = vsub.f32 %v2249_v46, %v926_v44  ;;  %v1009_v31 = vsub.f32 %v2251_v47, %v926_v44 }
 0x3e8   : > { %v1586_v15 = vpop.eup %1585  ;;  %v929_v32 = vpop.xlane.xlu1 %928  ;;  %v1184_v8 = vpack.c.bf16 %v1584_v9, %v1582_v42 }
 0x3e9   : > { %v1588_v45 = vpop.eup %1587  ;;  %v1096_v23 = vmul.f32 1.442695, %v1008_v57  ;;  %v1010_v24 = vsub.f32 %v2253_v48, %v929_v32  ;;  %v1011_v20 = vsub.f32 %v2257_v50, %v929_v32  ;;  %v1098_v49 = vmul.f32 1.442695, %v1009_v31 }
 0x3ea   : > { %v1185_v19 = vpack.c.bf16 %v1586_v15, %v1588_v45 }
 0x3eb   : > { %v1100_v25 = vmul.f32 1.442695, %v1010_v24  ;;  %v1102_v34 = vmul.f32 1.442695, %v1011_v20  ;;  %1597 = vpow2.f32 %v1096_v23 }
 0x3ec   : > { %1216 = vmatprep.subr.bf16.mxu1 %v1185_v19 }
 0x3ed   : > { %1599 = vpow2.f32 %v1100_v25  ;;  %1217 = vmatpush1.bf16.xpose.msra.mxu1 %v1184_v8  ;;  %v1590_v46 = vpop.eup %1589 }
 0x3ee   : > { %1601 = vpow2.f32 %v1102_v34  ;;  %v932_v47 = vpop.xlane.xlu0 %931 }
 0x3ef   : > { %v1592_v35 = vpop.eup %1591  ;;  %1603 = vpow2.f32 %v1098_v49  ;;  %v1012_v27 = vsub.f32 %v2261_v52, %v932_v47  ;;  %v1013_v55 = vsub.f32 %v2263_v53, %v932_v47 }
 0x3f0   : > { %v1594_v48 = vpop.eup %1593  ;;  %v935_v36 = vpop.xlane.xlu1 %934  ;;  %v1186_v50 = vpack.c.bf16 %v1592_v35, %v1590_v46 }
 0x3f1   : > { %v1596_v38 = vpop.eup %1595  ;;  %v1104_v43 = vmul.f32 1.442695, %v1012_v27  ;;  %v1014_v37 = vsub.f32 %v2265_v54, %v935_v36  ;;  %v1015_v5 = vsub.f32 %v2269_v56, %v935_v36  ;;  %v1106_v12 = vmul.f32 1.442695, %v1013_v55 }
 0x3f2   : > { %v1187_v11 = vpack.c.bf16 %v1594_v48, %v1596_v38 }
 0x3f3   : > { %v1108_v51 = vmul.f32 1.442695, %v1014_v37  ;;  %v1110_v18 = vmul.f32 1.442695, %v1015_v5  ;;  %1605 = vpow2.f32 %v1104_v43 }
 0x3f4   : > { %1218 = vmatprep.subr.bf16.mxu1 %v1187_v11 }
 0x3f5   : > { %1607 = vpow2.f32 %v1108_v51  ;;  %1219 = vmatpush1.bf16.xpose.msra.mxu1 %v1186_v50  ;;  %v1598_v52 = vpop.eup %1597 }
 0x3f6   : > { %1609 = vpow2.f32 %v1110_v18  ;;  %v938_v53 = vpop.xlane.xlu0 %937 }
 0x3f7   : > { %v1600_v7 = vpop.eup %1599  ;;  %1611 = vpow2.f32 %v1106_v12  ;;  %v1016_v14 = vsub.f32 %v2273_v17, %v938_v53  ;;  %v1017_v29 = vsub.f32 %v2275_v58, %v938_v53 }
 0x3f8   : > { %v1602_v54 = vpop.eup %1601  ;;  %v941_v30 = vpop.xlane.xlu1 %940  ;;  %v1188_v56 = vpack.c.bf16 %v1600_v7, %v1598_v52 }
 0x3f9   : > { %v1604_v40 = vpop.eup %1603  ;;  %v1112_v42 = vmul.f32 1.442695, %v1016_v14  ;;  %v1018_v44 = vsub.f32 %v2277_v59, %v941_v30  ;;  %v1019_v9 = vsub.f32 %v2281_v61, %v941_v30  ;;  %v1114_v31 = vmul.f32 1.442695, %v1017_v29 }
 0x3fa   : > { %v1189_v57 = vpack.c.bf16 %v1602_v54, %v1604_v40 }
 0x3fb   : > { %v1116_v15 = vmul.f32 1.442695, %v1018_v44  ;;  %v1118_v32 = vmul.f32 1.442695, %v1019_v9  ;;  %1613 = vpow2.f32 %v1112_v42 }
 0x3fc   : > { %1220 = vmatprep.subr.bf16.mxu1 %v1189_v57 }
 0x3fd   : > { %1615 = vpow2.f32 %v1116_v15  ;;  %1221 = vmatpush1.bf16.xpose.msra.mxu1 %v1188_v56  ;;  %v1606_v17 = vpop.eup %1605 }
 0x3fe   : > { %1617 = vpow2.f32 %v1118_v32  ;;  %v944_v58 = vpop.xlane.xlu0 %943 }
 0x3ff   : > { %v1608_v8 = vpop.eup %1607  ;;  %1619 = vpow2.f32 %v1114_v31  ;;  %v1020_v45 = vsub.f32 %v2285_v63, %v944_v58  ;;  %v1021_v23 = vsub.f32 %v2287_v0, %v944_v58  ;;  %v2610_v31 = vld [vmem:[#allocation12_spill] sm:$0xff] }
 0x400   : > { %v1610_v59 = vpop.eup %1609  ;;  %v947_v24 = vpop.xlane.xlu1 %946  ;;  %v1190_v61 = vpack.c.bf16 %v1608_v8, %v1606_v17  ;;  %v2611_v8 = vld [vmem:[#allocation13_spill] sm:$0xff] }
 0x401   : > { %v1612_v20 = vpop.eup %1611  ;;  %v1120_v19 = vmul.f32 1.442695, %v1020_v45  ;;  %v1022_v49 = vsub.f32 %v2289_v1, %v947_v24  ;;  %v1023_v25 = vsub.f32 %v2293_v3, %v947_v24  ;;  %v1122_v46 = vmul.f32 1.442695, %v1021_v23  ;;  %v2612_v23 = vld [vmem:[#allocation14_spill] sm:$0xff] }
 0x402   : > { %v1191_v34 = vpack.c.bf16 %v1610_v59, %v1612_v20 }
 0x403   : > { %v1124_v47 = vmul.f32 1.442695, %v1022_v49  ;;  %v1126_v35 = vmul.f32 1.442695, %v1023_v25  ;;  %1621 = vpow2.f32 %v1120_v19 }
 0x404   : > { %1222 = vmatprep.subr.bf16.mxu1 %v1191_v34  ;;  %v2613_v34 = vld [vmem:[#allocation15_spill] sm:$0xff] }
 0x405   : > { %1623 = vpow2.f32 %v1124_v47  ;;  %1223 = vmatpush1.bf16.xpose.msra.mxu1 %v1190_v61  ;;  %v1614_v63 = vpop.eup %1613  ;;  %v2614_v47 = vld [vmem:[#allocation16_spill] sm:$0xff] }
 0x406   : > { %1625 = vpow2.f32 %v1126_v35  ;;  %v950_v0 = vpop.xlane.xlu0 %949 }
 0x407   : > { %v1616_v27 = vpop.eup %1615  ;;  %1627 = vpow2.f32 %v1122_v46  ;;  %v1024_v55 = vsub.f32 %v2297_v13, %v950_v0  ;;  %v1025_v48 = vsub.f32 %v2299_v4, %v950_v0 }
 0x408   : > { %v1618_v1 = vpop.eup %1617  ;;  %v953_v36 = vpop.xlane.xlu1 %952  ;;  %v1192_v3 = vpack.c.bf16 %v1616_v27, %v1614_v63 }
 0x409   : > { %v1620_v50 = vpop.eup %1619  ;;  %v1128_v38 = vmul.f32 1.442695, %v1024_v55  ;;  %v1026_v43 = vsub.f32 %v2301_v21, %v953_v36  ;;  %v1027_v37 = vsub.f32 %v2305_v10, %v953_v36  ;;  %v1130_v11 = vmul.f32 1.442695, %v1025_v48  ;;  %v2615_v36 = vld [vmem:[#allocation17_spill] sm:$0xff] }
 0x40a   : > { %v1193_v5 = vpack.c.bf16 %v1618_v1, %v1620_v50  ;;  %v2616_v50 = vld [vmem:[#allocation18_spill] sm:$0xff] }
 0x40b   : > { %v1132_v12 = vmul.f32 1.442695, %v1026_v43  ;;  %v1134_v51 = vmul.f32 1.442695, %v1027_v37  ;;  %1629 = vpow2.f32 %v1128_v38 }
 0x40c   : > { %1224 = vmatprep.subr.bf16.mxu1 %v1193_v5 }
 0x40d   : > { %1631 = vpow2.f32 %v1132_v12  ;;  %1225 = vmatpush1.bf16.xpose.msra.mxu1 %v1192_v3  ;;  %v1622_v13 = vpop.eup %1621 }
 0x40e   : > { %1633 = vpow2.f32 %v1134_v51  ;;  %v956_v4 = vpop.xlane.xlu0 %955 }
 0x40f   : > { %v1624_v18 = vpop.eup %1623  ;;  %1635 = vpow2.f32 %v1130_v11  ;;  %v1028_v52 = vsub.f32 %v2309_v22, %v956_v4  ;;  %v1029_v53 = vsub.f32 %v2311_v26, %v956_v4 }
 0x410   : > { %v1626_v21 = vpop.eup %1625  ;;  %v959_v7 = vpop.xlane.xlu1 %958  ;;  %v1194_v10 = vpack.c.bf16 %v1624_v18, %v1622_v13  ;;  %v2617_v13 = vld [vmem:[#allocation19_spill] sm:$0xff]  ;;  %v2618_v18 = vld [vmem:[#allocation20_spill] sm:$0xff] }
 0x411   : > { %v1628_v14 = vpop.eup %1627  ;;  %v1136_v29 = vmul.f32 1.442695, %v1028_v52  ;;  %v1030_v54 = vsub.f32 %v2313_v28, %v959_v7  ;;  %v1031_v30 = vsub.f32 %v2317_v33, %v959_v7  ;;  %v1138_v40 = vmul.f32 1.442695, %v1029_v53 }
 0x412   : > { %v1195_v56 = vpack.c.bf16 %v1626_v21, %v1628_v14 }
 0x413   : > { %v1140_v42 = vmul.f32 1.442695, %v1030_v54  ;;  %v1142_v44 = vmul.f32 1.442695, %v1031_v30  ;;  %1637 = vpow2.f32 %v1136_v29  ;;  %v2619_v54 = vld [vmem:[#allocation21_spill] sm:$0xff] }
 0x414   : > { %1226 = vmatprep.subr.bf16.mxu1 %v1195_v56  ;;  %v2620_v56 = vld [vmem:[#allocation22_spill] sm:$0xff] }
 0x415   : > { %1639 = vpow2.f32 %v1140_v42  ;;  %1227 = vmatpush1.bf16.xpose.msra.mxu1 %v1194_v10  ;;  %v1630_v22 = vpop.eup %1629 }
 0x416   : > { %1641 = vpow2.f32 %v1142_v44  ;;  %v962_v26 = vpop.xlane.xlu0 %961 }
 0x417   : > { %v1632_v9 = vpop.eup %1631  ;;  %1643 = vpow2.f32 %v1138_v40  ;;  %v1032_v57 = vsub.f32 %v2321_v39, %v962_v26  ;;  %v1033_v15 = vsub.f32 %v2610_v31, %v962_v26 }
 0x418   : > { %v1634_v28 = vpop.eup %1633  ;;  %v965_v32 = vpop.xlane.xlu1 %964  ;;  %v1196_v33 = vpack.c.bf16 %v1632_v9, %v1630_v22 }
 0x419   : > { %v1636_v17 = vpop.eup %1635  ;;  %v1144_v58 = vmul.f32 1.442695, %v1032_v57  ;;  %v1034_v45 = vsub.f32 %v2611_v8, %v965_v32  ;;  %v1035_v59 = vsub.f32 %v2612_v23, %v965_v32  ;;  %v1146_v61 = vmul.f32 1.442695, %v1033_v15  ;;  %v2621_v23 = vld [vmem:[#allocation27_spill] sm:$0xff] }
 0x41a   : > { %v1197_v24 = vpack.c.bf16 %v1634_v28, %v1636_v17 }
 0x41b   : > { %v1148_v20 = vmul.f32 1.442695, %v1034_v45  ;;  %v1150_v19 = vmul.f32 1.442695, %v1035_v59  ;;  %1645 = vpow2.f32 %v1144_v58 }
 0x41c   : > { %1228 = vmatprep.subr.bf16.mxu1 %v1197_v24  ;;  %v2622_v24 = vld [vmem:[#allocation28_spill] sm:$0xff] }
 0x41d   : > { %1647 = vpow2.f32 %v1148_v20  ;;  %1229 = vmatpush1.bf16.xpose.msra.mxu1 %v1196_v33  ;;  %v1638_v39 = vpop.eup %1637  ;;  %v2623_v20 = vld [vmem:[#allocation25_spill] sm:$0xff] }
 0x41e   : > { %1649 = vpow2.f32 %v1150_v19  ;;  %v968_v49 = vpop.xlane.xlu0 %967 }
 0x41f   : > { %v1640_v25 = vpop.eup %1639  ;;  %1651 = vpow2.f32 %v1146_v61  ;;  %v1036_v46 = vsub.f32 %v2613_v34, %v968_v49  ;;  %v1037_v35 = vsub.f32 %v2614_v47, %v968_v49 }
 0x420   : > { %v1642_v63 = vpop.eup %1641  ;;  %v971_v0 = vpop.xlane.xlu1 %970  ;;  %v1198_v27 = vpack.c.bf16 %v1640_v25, %v1638_v39  ;;  %v2624_v39 = vld [vmem:[#allocation26_spill] sm:$0xff] }
 0x421   : > { %v1644_v55 = vpop.eup %1643  ;;  %v1152_v48 = vmul.f32 1.442695, %v1036_v46  ;;  %v1154_v1 = vmul.f32 1.442695, %v1037_v35  ;;  %v1038_v3 = vsub.f32 %v2615_v36, %v971_v0  ;;  %v1039_v38 = vsub.f32 %v2616_v50, %v971_v0 }
 0x422   : > { %v1199_v43 = vpack.c.bf16 %v1642_v63, %v1644_v55  ;;  %v2625_v63 = vld [vmem:[#allocation23_spill] sm:$0xff] }
 0x423   : > { %1653 = vpow2.f32 %v1152_v48  ;;  %v1156_v37 = vmul.f32 1.442695, %v1038_v3  ;;  %v1158_v5 = vmul.f32 1.442695, %v1039_v38 }
 0x424   : > { %1655 = vpow2.f32 %v1154_v1  ;;  %1230 = vmatprep.subr.bf16.mxu1 %v1199_v43 }
 0x425   : > { %1657 = vpow2.f32 %v1156_v37  ;;  %1231 = vmatpush1.bf16.xpose.msra.mxu1 %v1198_v27  ;;  %v1646_v11 = vpop.eup %1645  ;;  %v2626_v27 = vld [vmem:[#allocation24_spill] sm:$0xff] }
 0x426   : > { %1659 = vpow2.f32 %v1158_v5  ;;  %v974_v12 = vpop.xlane.xlu0 %973 }
 0x427   : > { %v1648_v51 = vpop.eup %1647  ;;  %v1040_v4 = vsub.f32 %v2617_v13, %v974_v12  ;;  %v1041_v52 = vsub.f32 %v2618_v18, %v974_v12 }
 0x428   : > { %v1650_v53 = vpop.eup %1649  ;;  %v977_v21 = vpop.xlane.xlu1 %976  ;;  %v1200_v7 = vpack.c.bf16 %v1648_v51, %v1646_v11  ;;  %v2627_v51 = vld [vmem:[#allocation29_spill] sm:$0xff] }
 0x429   : > { %v1652_v10 = vpop.eup %1651  ;;  %v1160_v14 = vmul.f32 1.442695, %v1040_v4  ;;  %v1162_v29 = vmul.f32 1.442695, %v1041_v52  ;;  %v1042_v30 = vsub.f32 %v2619_v54, %v977_v21  ;;  %v1043_v40 = vsub.f32 %v2620_v56, %v977_v21  ;;  %v2628_v4 = vld [vmem:[#allocation30_spill] sm:$0xff] }
 0x42a   : > { %v1201_v42 = vpack.c.bf16 %v1650_v53, %v1652_v10 }
 0x42b   : > { %1661 = vpow2.f32 %v1160_v14  ;;  %v1164_v44 = vmul.f32 1.442695, %v1042_v30  ;;  %v1166_v22 = vmul.f32 1.442695, %v1043_v40 }
 0x42c   : > { %1663 = vpow2.f32 %v1162_v29  ;;  %1232 = vmatprep.subr.bf16.mxu1 %v1201_v42  ;;  %v447_v33 = vpop.permute.xlu1 %446 }
 0x42d   : > { %v1654_v26 = vpop.eup %1653  ;;  %1665 = vpow2.f32 %v1164_v44  ;;  %1233 = vmatpush1.bf16.xpose.msra.mxu1 %v1200_v7  ;;  %v571_v59 = vadd.f32 %v2621_v23, %v447_v33  ;;  %v573_v61 = vadd.f32 %v2622_v24, %v447_v33  ;;  %v2629_v33 = vld [vmem:[#allocation11_spill] sm:$0xff] }
 0x42e   : > { %v1656_v9 = vpop.eup %1655  ;;  %1667 = vpow2.f32 %v1166_v22  ;;  %v980_v32 = vpop.xlane.xlu0 %979 }
 0x42f   : > { %v1658_v57 = vpop.eup %1657  ;;  %v1044_v0 = vsub.f32 %v2625_v63, %v980_v32  ;;  %v1045_v55 = vsub.f32 %v2626_v27, %v980_v32 }
 0x430   : > { %v1660_v31 = vpop.eup %1659  ;;  %v1202_v15 = vpack.c.bf16 %v1658_v57, %v1654_v26 }
 0x431   : > { %v1203_v28 = vpack.c.bf16 %v1660_v31, %v1656_v9  ;;  %v1168_v48 = vmul.f32 1.442695, %v1044_v0  ;;  %v1170_v1 = vmul.f32 1.442695, %v1045_v55  ;;  %v1685_v0 = vld [vmem:[%s2006_s29 + $0x8] sm:$0xff]  ;;  %v1686_v55 = vld [vmem:[%s2006_s29 + $0x18] sm:$0xff] }
 0x433   : > { %1234 = vmatprep.subr.bf16.mxu1 %v1203_v28  ;;  %1669 = vpow2.f32 %v1168_v48 }
 0x434   : > { %1671 = vpow2.f32 %v1170_v1  ;;  %v1687_v1 = vld [vmem:[%s2006_s29 + $0x28] sm:$0xff] }
 0x435   : > { %v1662_v17 = vpop.eup %1661  ;;  %1235 = vmatpush1.bf16.xpose.msra.mxu1 %v1202_v15 }
 0x436   : > { %v1664_v58 = vpop.eup %1663  ;;  %v442_v8 = vpop.permute.xlu0 %441 }
 0x437   : > { %v1666_v45 = vpop.eup %1665  ;;  %v565_v19 = vadd.f32 %v2623_v20, %v442_v8  ;;  %v567_v49 = vadd.f32 %v2624_v39, %v442_v8  ;;  %v1681_v39 = vld [vmem:[%s2006_s29] sm:$0xff] }
 0x438   : > { %v1668_v25 = vpop.eup %1667  ;;  %v1204_v34 = vpack.c.bf16 %v1666_v45, %v1662_v17 }
 0x439   : > { %v601_v46 = vpack.c.bf16 %v571_v59, %v565_v19  ;;  %v602_v47 = vpack.c.bf16 %v573_v61, %v567_v49  ;;  %v1205_v35 = vpack.c.bf16 %v1668_v25, %v1664_v58  ;;  %v1682_v25 = vld [vmem:[%s2006_s29 + $0x10] sm:$0xff] }
 0x43a   : > { %v457_v3 = vpop.permute.xlu0 %456 }
 0x43b   : > { %1236 = vmatprep.subr.bf16.mxu1 %v1205_v35  ;;  %1240 = vmatprep.mubr.bf16.mxu1 %v602_v47  ;;  %v583_v5 = vadd.f32 %v2394_v6, %v457_v3  ;;  %v585_v12 = vadd.f32 %v2396_v2, %v457_v3  ;;  %v1684_v35 = vld [vmem:[%s2006_s29 + $0x30] sm:$0xff]  ;;  %v1688_v3 = vld [vmem:[%s2006_s29 + $0x38] sm:$0xff] }
 0x43d   : > { %1237 = vmatpush1.bf16.xpose.msra.mxu1 %v1204_v34 }
 0x45d   : > { %v983_v36 = vpop.xlane.xlu1 %982 }
 0x45e   : > { %v1046_v50 = vsub.f32 %v2363_v62, %v983_v36  ;;  %v1047_v38 = vsub.f32 %v2365_v60, %v983_v36  ;;  %v1670_v62 = vpop.eup %1669 }
 0x45f   : > { %v1672_v21 = vpop.eup %1671 }
 0x460   : > { %v1172_v43 = vmul.f32 1.442695, %v1046_v50  ;;  %v1174_v37 = vmul.f32 1.442695, %v1047_v38 }
 0x461   : > { %v452_v11 = vpop.permute.xlu1 %451 }
 0x462   : > { %1673 = vpow2.f32 %v1172_v43  ;;  %v577_v13 = vadd.f32 %v2627_v51, %v452_v11  ;;  %v579_v18 = vadd.f32 %v2628_v4, %v452_v11 }
 0x463   : > { %1675 = vpow2.f32 %v1174_v37 }
 0x464   : > { %v603_v52 = vpack.c.bf16 %v583_v5, %v577_v13  ;;  %v604_v53 = vpack.c.bf16 %v585_v12, %v579_v18 }
 0x465   : > { %v462_v6 = vpop.permute.xlu1 %461 }
 0x466   : > { %v591_v2 = vadd.f32 %v2429_v16, %v462_v6  ;;  %v589_v54 = vadd.f32 %v2427_v41, %v462_v6 }
 0x468   : > { %v606_v29 = vpack.c.bf16 %v591_v2, %v591_v2  ;;  %v605_v30 = vpack.c.bf16 %v589_v54, %v589_v54 }
 0x46c   : > { %v1674_v60 = vpop.eup %1673 }
 0x46d   : > { %v1676_v7 = vpop.eup %1675  ;;  %v1206_v10 = vpack.c.bf16 %v1674_v60, %v1670_v62 }
 0x46e   : > { %v1207_v14 = vpack.c.bf16 %v1676_v7, %v1672_v21 }
 0x470   : > { %1238 = vmatprep.subr.bf16.mxu1 %v1207_v14 }
 0x471   : > { %1239 = vmatpush1.bf16.xpose.msra.mxu1 %v1206_v10 }
 0x478   : > { %1241 = vmatmul.mubr.bf16.vlgmr.msra.gmra.mrb[64].mxu1 %v601_v46  ;;  %v1683_v46 = vld [vmem:[%s2006_s29 + $0x20] sm:$0xff]  ;;  %s1828_s29 = smov [#allocation7]  }
 0x479   : > { %1250 = vmatprep.mubr.bf16.mxu1 %v604_v53  ;;  %s1751_s21 = sshll.u32 %s1828_s29, 4  ;;  %s1752_s21 = int_to_ptr.vmem [resolvable:$false] %s1751_s21 }
 0x47a   : > { %s1753_s13 = scalar_lea.vmem %s1752_s21, 2048  ;;  %p1754_p10 = scmp.lt.s32.totalorder %s2502_s25, %s1752_s21 }
 0x47b   : > { %p1755_p13 = scmp.lt.s32.totalorder %s1753_s13, %s1747_s23 }
 0x47d   : > { %p1756_p3 = por %p1755_p13, %p1754_p10 }
 0x47f   : > { %p1757_p7 = pnand %p1756_p3, %p1750_p8 }
 0x480   : > { %1251 = vmatmul.mubr.bf16.gmra.mrb[68].mxu1 %v603_v52 }
 0x481   : > { %1260 = vmatprep.mubr.bf16.mxu1 %v606_v29 }
 0x488   : > { %1261 = vmatmul.mubr.bf16.gmra.mrb[72].mxu1 %v605_v30 }
 0x54b   : > { %v1242_v56 = vpop.f32.mrb[64].mxu1 }
 0x54c   : > { %v1244_v40 = vpop.f32.mrb[65].mxu1 }
 0x54d   : > { %v1246_v42 = vpop.f32.mrb[66].mxu1 }
 0x54e   : > { %v1248_v44 = vpop.f32.mrb[67].mxu1 }
 0x553   : > { %v1252_v22 = vpop.f32.mrb[68].mxu1 }
 0x554   : > { %v1254_v26 = vpop.f32.mrb[69].mxu1 }
 0x555   : > { %v1256_v9 = vpop.f32.mrb[70].mxu1 }
 0x556   : > { %v1258_v57 = vpop.f32.mrb[71].mxu1 }
 0x55b   : > { %v1262_v31 = vpop.f32.mrb[72].mxu1 }
 0x55c   : > { %1677 = vrcp.f32 %v1262_v31  ;;  %v1264_v16 = vpop.f32.mrb[73].mxu1 }
 0x55d   : > { %1679 = vrcp.f32 %v1264_v16  ;;  %v1266_v15 = vpop.f32.mrb[74].mxu1 }
 0x55e   : > { %v1267_v28 = vpop.f32.mrb[75].mxu1 }
 0x566   : > { %v1678_v41 = vpop.eup %1677 }
 0x567   : > { %v1680_v32 = vpop.eup %1679  ;;  %v1274_v17 = vrot.slane %v1678_v41, %v2629_v33 }
 0x568   : > { %v1278_v58 = vrot.slane %v1680_v32, %v2629_v33 }
 0x569   : > { %v1279_v8 = vmul.f32 %v1274_v17, %v1242_v56  ;;  %v1281_v45 = vmul.f32 %v1274_v17, %v1246_v42  ;;  %v1283_v23 = vmul.f32 %v1274_v17, %v1252_v22  ;;  %v1285_v59 = vmul.f32 %v1274_v17, %v1256_v9 }
 0x56a   : > { %v1280_v24 = vmul.f32 %v1278_v58, %v1244_v40  ;;  %v1282_v61 = vmul.f32 %v1278_v58, %v1248_v44  ;;  %v1284_v20 = vmul.f32 %v1278_v58, %v1254_v26  ;;  %v1286_v19 = vmul.f32 %v1278_v58, %v1258_v57 }
 0x56b   : > { %v1287_v49 = vadd.f32 %v1681_v39, %v1279_v8  ;;  %v1289_v34 = vadd.f32 %v1682_v25, %v1281_v45  ;;  %v1291_v47 = vadd.f32 %v1683_v46, %v1283_v23  ;;  %v1293_v63 = vadd.f32 %v1684_v35, %v1285_v59 }
 0x56c   : > { %v1288_v27 = vadd.f32 %v1685_v0, %v1280_v24  ;;  %v1290_v48 = vadd.f32 %v1686_v55, %v1282_v61  ;;  %v1292_v36 = vadd.f32 %v1687_v1, %v1284_v20  ;;  %v1294_v50 = vadd.f32 %v1688_v3, %v1286_v19 }
 0x56d   : > { %1295 = vst [vmem:[%s2486_s8] sm:$0xff] %v1287_v49  ;;  %1297 = vst [vmem:[%s2486_s8 + $0x10] sm:$0xff] %v1289_v34 }
 0x56e   : > { %1299 = vst [vmem:[%s2486_s8 + $0x20] sm:$0xff] %v1291_v47  ;;  %1301 = vst [vmem:[%s2486_s8 + $0x30] sm:$0xff] %v1293_v63 }
 0x56f   : > { %1296 = vst [vmem:[%s2486_s8 + $0x8] sm:$0xff] %v1288_v27  ;;  %1298 = vst [vmem:[%s2486_s8 + $0x18] sm:$0xff] %v1290_v48 }
 0x570   : > { %1300 = vst [vmem:[%s2486_s8 + $0x28] sm:$0xff] %v1292_v36  ;;  %1302 = vst [vmem:[%s2486_s8 + $0x38] sm:$0xff] %v1294_v50 }
 0x571   : > { %1760 = shalt.err (!%p1757_p7)
}
 0x572   : > { %s1761_s9 = scalar_lea.hbm %s2496_s14, 1024  ;;  %s1765_s6 = scalar_lea.hbm %s2559_s4, 2048 }
 0x573   : > { %p1762_p9 = scmp.ne.s32.totalorder %s2496_s14, %s1761_s9  ;;  %p1766_p5 = scmp.lt.u32.totalorder %s2496_s14, %s2559_s4 }
 0x574   : > { %p1767_p11 = scmp.lt.u32.totalorder %s1765_s6, %s1761_s9  ;;  %p1769_p4 = scmp.lt.u32.totalorder %s1761_s9, %s2496_s14 }
 0x575   : > { %p1763_p1 = pnand %p1762_p9, %p1949_p12 }
 0x576   : > { %p1768_p2 = por %p1767_p11, %p1766_p5 }
 0x577   : > { %p1764_p0 = pneg %p1763_p1 }
 0x578   : > { %p1770_p6 = por %p1769_p4, %p1768_p2 }
 0x57a   : > { %p1771_p8 = pnand %p1770_p6, %p1764_p0 }
 0x57c   : > { %1774 = shalt.err (!%p1771_p8)
}
 0x57d   : > { %s1829_s8 = smov 256  }
 0x57e   : > { %1488 = dma.vmem_to_hbm [thread:$0]  (%p1949_p12), %s2502_s25, 1024, %s2496_s14, %s1304_s5, %s1829_s8, %s1829_s8, %s1825_s12  }
 0x57f PF: > { %s1332_s19 = sand.u32 1, %s1805_s15   ;;  %p2630_p10 = scmp.ne.s32.totalorder %s2579_s22, 0 }
 0x580   : > { %p2631_p13 = scmp.ge.s32.totalorder %s1817_s18, 2  ;;  %s1333_s20 = scalar_lea.sflag [#allocation4], %s1332_s19 }
 0x582   : > { %p1499_p3 = pnand %p2631_p13, %p2630_p10 }
 0x584   : > { %1800 = dma.done.wait (!%p1499_p3), %s1333_s20, 1024  }
 0x585   : > { %1802 = vsyncadd (!%p1499_p3), %s1333_s20, 4294966272  ;;  %p18_p7 = scmp.ge.s32.totalorder %s1911_s27, 4   ;;  %s2632_s15 = smov %s1809_s16 }
 0x586   : > { %s2633_s16 = smov %s1813_s17  ;;  %s2634_s17 = smov %s1945_s24 }
 0x587   : > { %s2635_s18 = smov %s1911_s27  ;;  %20 = sbr.rel (!%p18_p7) target bundleno = 6 (0x6), region = 85 }
 0x58e   :  { %1338 = vsyncpa [#allocation3], 1 }
 0x58f   :  { %1340 = vsyncpa [#allocation3 + $0x1], 1 }
 0x590   :  { %1341 = vsyncpa [#allocation6], 1 }
 0x591   :  { %1342 = vsyncpa [#allocation4], 1 }
 0x592   :  { %1344 = vsyncpa [#allocation4 + $0x1], 1 }

</bundles_post_ra>
